<compile_context>
chip_gen: v7x
topology: tpu7x:2x2x1
jax: 0.10.0
libtpu: 0.0.40
codegen_flags: <defaults>
</compile_context>

<pallas_src>
import functools

import jax
import jax.numpy as jnp
from jax.experimental import pallas as pl
from jax.experimental.pallas import tpu as pltpu


def _round_up(x, m):
    return (x + m - 1) // m * m


# ----------------------------------------------------------------------------
# Row-tiled matmul + bias kernel:  out = x @ w + b    (w already transposed: (K, N))
# Used for the hoisted layer-0 input projection and for the FC head.
# ----------------------------------------------------------------------------
def _matmul_bias_kernel(x_ref, w_ref, b_ref, out_ref):
    out_ref[...] = (
        jnp.dot(x_ref[...], w_ref[...], preferred_element_type=jnp.float32)
        + b_ref[...]
    ).astype(out_ref.dtype)


def matmul_bias(x, w, b, *, block_rows=512):
    """x: (M, K), w: (K, N) pre-transposed, b: (1, N). Returns (M, N) float32."""
    M, K = x.shape
    N = w.shape[1]
    bm = min(block_rows, _round_up(M, 8))
    M_pad = _round_up(M, bm)
    if M_pad != M:
        x = jnp.pad(x, ((0, M_pad - M), (0, 0)))
    out = pl.pallas_call(
        _matmul_bias_kernel,
        out_shape=jax.ShapeDtypeStruct((M_pad, N), jnp.float32),
        grid_spec=pltpu.PrefetchScalarGridSpec(
            num_scalar_prefetch=0,
            grid=(M_pad // bm,),
            in_specs=[
                pl.BlockSpec((bm, K), lambda i: (i, 0)),   # row tile of x
                pl.BlockSpec((K, N), lambda i: (0, 0)),    # full weight (resident)
                pl.BlockSpec((1, N), lambda i: (0, 0)),    # bias row
            ],
            out_specs=pl.BlockSpec((bm, N), lambda i: (i, 0)),
        ),
        compiler_params=pltpu.CompilerParams(
            dimension_semantics=("parallel",)  # independent rows -> megacore split
        ),
    )(x, w, b)
    return out[:M] if M_pad != M else out


# ----------------------------------------------------------------------------
# Fused multi-layer RNN recurrence.
#   layer 0 : h0_t = tanh(xproj_t              + h0_{t-1} @ W_hh0^T)   (bias in xproj)
#   layer l : hl_t = tanh(h_{l-1}_t @ W_ihl^T  + hl_{t-1} @ W_hhl^T + b_l)
# One grid step = `chunk` timesteps; hidden states persist in VMEM scratch.
# ----------------------------------------------------------------------------
def _fused_rnn_kernel(xproj_ref, wih_ref, whh_ref, b_ref, out_ref, h_scratch,
                      *, num_layers, chunk):
    # xproj_ref : (chunk, Bp, Hp)  layer-0 input projection (bias folded in)
    # wih_ref   : (L, Hp, Hp)      W_ih^T per layer (slot 0 unused)
    # whh_ref   : (L, Hp, Hp)      W_hh^T per layer
    # b_ref     : (L, 1, Hp)       combined bias per layer (slot 0 folded into xproj)
    # out_ref   : (chunk, Bp, Hp)  last layer's hidden states
    # h_scratch : (L, Bp, Hp)      per-layer hidden state, carried across grid steps
    @pl.when(pl.program_id(0) == 0)
    def _():
        h_scratch[...] = jnp.zeros_like(h_scratch)

    def step(t, carry):
        h = jnp.tanh(
            xproj_ref[t]
            + jnp.dot(h_scratch[0], whh_ref[0], preferred_element_type=jnp.float32)
        )
        h_scratch[0] = h
        for l in range(1, num_layers):
            h = jnp.tanh(
                jnp.dot(h, wih_ref[l], preferred_element_type=jnp.float32)
                + jnp.dot(h_scratch[l], whh_ref[l], preferred_element_type=jnp.float32)
                + b_ref[l]
            )
            h_scratch[l] = h
        out_ref[t] = h.astype(out_ref.dtype)
        return carry

    jax.lax.fori_loop(0, chunk, step, 0, unroll=True)


def fused_rnn(xproj, wih_stack, whh_stack, b_stack, *, chunk):
    """xproj: (S_pad, B_pad, H_pad) time-major. Returns last-layer h, same shape."""
    S_pad, B_pad, H_pad = xproj.shape
    L = whh_stack.shape[0]
    kernel = functools.partial(_fused_rnn_kernel, num_layers=L, chunk=chunk)
    return pl.pallas_call(
        kernel,
        out_shape=jax.ShapeDtypeStruct((S_pad, B_pad, H_pad), jnp.float32),
        grid_spec=pltpu.PrefetchScalarGridSpec(
            num_scalar_prefetch=0,
            grid=(S_pad // chunk,),
            in_specs=[
                pl.BlockSpec((chunk, B_pad, H_pad), lambda c: (c, 0, 0)),  # xproj chunk
                pl.BlockSpec((L, H_pad, H_pad), lambda c: (0, 0, 0)),      # W_ih^T stack
                pl.BlockSpec((L, H_pad, H_pad), lambda c: (0, 0, 0)),      # W_hh^T stack
                pl.BlockSpec((L, 1, H_pad), lambda c: (0, 0, 0)),          # bias stack
            ],
            out_specs=pl.BlockSpec((chunk, B_pad, H_pad), lambda c: (c, 0, 0)),
            scratch_shapes=[pltpu.VMEM((L, B_pad, H_pad), jnp.float32)],
        ),
        compiler_params=pltpu.CompilerParams(
            dimension_semantics=("arbitrary",)  # sequential recurrence over time
        ),
    )(xproj, wih_stack, whh_stack, b_stack)


# ----------------------------------------------------------------------------
# Parameters: raw PyTorch-layout init, then a "prepare" step that pads to TPU tile
# sizes (H, O -> multiple of 128) and pre-transposes/stacks the weights.
# ----------------------------------------------------------------------------
def init_params(key, input_dim, hidden_dim, layer_dim, output_dim):
    params = {"rnn": []}
    bound = 1.0 / jnp.sqrt(hidden_dim)
    for l in range(layer_dim):
        d_in = input_dim if l == 0 else hidden_dim
        key, k1, k2, k3, k4 = jax.random.split(key, 5)
        params["rnn"].append({
            "w_ih": jax.random.uniform(k1, (hidden_dim, d_in), jnp.float32, -bound, bound),
            "w_hh": jax.random.uniform(k2, (hidden_dim, hidden_dim), jnp.float32, -bound, bound),
            "b_ih": jax.random.uniform(k3, (hidden_dim,), jnp.float32, -bound, bound),
            "b_hh": jax.random.uniform(k4, (hidden_dim,), jnp.float32, -bound, bound),
        })
    key, k5, k6 = jax.random.split(key, 3)
    params["fc_w"] = jax.random.uniform(k5, (output_dim, hidden_dim), jnp.float32, -bound, bound)
    params["fc_b"] = jax.random.uniform(k6, (output_dim,), jnp.float32, -bound, bound)
    return params


def prepare_params(raw, *, input_dim, hidden_dim, layer_dim, output_dim):
    H, L, O = hidden_dim, layer_dim, output_dim
    Hp = _round_up(H, 128)
    Op = _round_up(O, 128)

    def pad2(a, rows, cols):
        return jnp.pad(a, ((0, rows - a.shape[0]), (0, cols - a.shape[1])))

    l0 = raw["rnn"][0]
    wih0_T = pad2(l0["w_ih"].T, input_dim, Hp)                   # (D, Hp)
    b0 = pad2((l0["b_ih"] + l0["b_hh"]).reshape(1, H), 1, Hp)    # (1, Hp)

    wih_stack = jnp.zeros((L, Hp, Hp), jnp.float32)
    whh_stack = jnp.zeros((L, Hp, Hp), jnp.float32)
    b_stack = jnp.zeros((L, 1, Hp), jnp.float32)
    for l, layer in enumerate(raw["rnn"]):
        whh_stack = whh_stack.at[l].set(pad2(layer["w_hh"].T, Hp, Hp))
        if l > 0:
            wih_stack = wih_stack.at[l].set(pad2(layer["w_ih"].T, Hp, Hp))
            b_stack = b_stack.at[l].set(
                pad2((layer["b_ih"] + layer["b_hh"]).reshape(1, H), 1, Hp))

    return {
        "wih0_T": wih0_T, "b0": b0,
        "wih_stack": wih_stack, "whh_stack": whh_stack, "b_stack": b_stack,
        "fc_wT": pad2(raw["fc_w"].T, Hp, Op),                    # (Hp, Op)
        "fc_b": pad2(raw["fc_b"].reshape(1, O), 1, Op),          # (1, Op)
    }


# ----------------------------------------------------------------------------
# Full model forward (batch_first, matching PyTorch semantics).
# ----------------------------------------------------------------------------
def make_forward(prepared, *, output_dim, chunk=4):
    Hp = prepared["whh_stack"].shape[-1]
    Op = prepared["fc_wT"].shape[-1]

    @jax.jit
    def forward(x):
        B, S, D = x.shape
        Bp = _round_up(B, 8)
        Sp = _round_up(S, chunk)

        # batch-first -> time-major; zero-pad batch/time (inert, sliced off at end)
        x_tm = jnp.transpose(x, (1, 0, 2))
        x_tm = jnp.pad(x_tm, ((0, Sp - S), (0, Bp - B), (0, 0)))

        # Hoisted layer-0 input projection over ALL timesteps as one big matmul.
        xproj = matmul_bias(
            x_tm.reshape(Sp * Bp, D), prepared["wih0_T"], prepared["b0"]
        ).reshape(Sp, Bp, Hp)

        # Fused multi-layer recurrence (weights resident in VMEM).
        h_last = fused_rnn(
            xproj, prepared["wih_stack"], prepared["whh_stack"],
            prepared["b_stack"], chunk=chunk)

        # FC head over all timesteps; slice off padding, back to batch-first.
        out = matmul_bias(
            h_last.reshape(Sp * Bp, Hp), prepared["fc_wT"], prepared["fc_b"]
        ).reshape(Sp, Bp, Op)[:S, :B, :output_dim]
        return jnp.transpose(out, (1, 0, 2))

    return forward


# ----------------------------------------------------------------------------
# Pure-JAX reference with identical semantics (for correctness check).
# ----------------------------------------------------------------------------
def reference_forward(x, raw):
    h = jnp.transpose(x, (1, 0, 2))  # (S, B, D)
    for layer in raw["rnn"]:
        B = h.shape[1]
        H = layer["w_hh"].shape[0]

        def step(h_prev, x_t, layer=layer):
            h_new = jnp.tanh(
                x_t @ layer["w_ih"].T + layer["b_ih"]
                + h_prev @ layer["w_hh"].T + layer["b_hh"])
            return h_new, h_new

        _, h = jax.lax.scan(step, jnp.zeros((B, H), jnp.float32), h)
    out = h @ raw["fc_w"].T + raw["fc_b"]
    return jnp.transpose(out, (1, 0, 2))


if __name__ == "__main__":
    # Small shapes consistent with the module: x is (batch, seq, input_dim).
    batch, seq = 2, 8
    input_dim, hidden_dim, layer_dim, output_dim = 16, 32, 2, 8

    key = jax.random.PRNGKey(0)
    key, xkey = jax.random.split(key)
    x = jax.random.normal(xkey, (batch, seq, input_dim), jnp.float32)

    raw = init_params(key, input_dim, hidden_dim, layer_dim, output_dim)
    prepared = prepare_params(raw, input_dim=input_dim, hidden_dim=hidden_dim,
                              layer_dim=layer_dim, output_dim=output_dim)

    forward = make_forward(prepared, output_dim=output_dim, chunk=4)
    out = jax.block_until_ready(forward(x))

    ref = reference_forward(x, raw)
    assert out.shape == (batch, seq, output_dim)
    assert jnp.allclose(out, ref, rtol=1e-4, atol=1e-4), float(jnp.max(jnp.abs(out - ref)))

    print("KERNEL_OK")
</pallas_src>

<mosaic_0001>
module attributes {stable_mosaic.version = 11 : i64} {
  func.func @_matmul_bias_kernel(%arg0: i32, %arg1: memref<64x16xf32, #tpu.memory_space<vmem>>, %arg2: memref<16x128xf32, #tpu.memory_space<vmem>>, %arg3: memref<1x128xf32, #tpu.memory_space<vmem>>, %arg4: memref<64x128xf32, #tpu.memory_space<vmem>>) attributes {dimension_semantics = [#tpu.dimension_semantics<parallel>], iteration_bounds = array<i64: 1>, scalar_prefetch = 0 : i64, scratch_operands = 0 : i64, tpu.core_type = #tpu.core_type<tc>, window_params = [{transform_indices = @transform_0, window_bounds = array<i64: 64, 16>}, {pipeline_mode = #tpu.pipeline_mode<synchronous>, transform_indices = @transform_1, window_bounds = array<i64: 16, 128>}, {pipeline_mode = #tpu.pipeline_mode<synchronous>, transform_indices = @transform_2, window_bounds = array<i64: 1, 128>}, {transform_indices = @transform_3, window_bounds = array<i64: 64, 128>}]} {
    %c0 = arith.constant 0 : index
    %c0_0 = arith.constant 0 : index
    %0 = vector.load %arg1[%c0, %c0_0] : memref<64x16xf32, #tpu.memory_space<vmem>>, vector<64x16xf32>
    %c0_1 = arith.constant 0 : index
    %c0_2 = arith.constant 0 : index
    %1 = vector.load %arg2[%c0_1, %c0_2] : memref<16x128xf32, #tpu.memory_space<vmem>>, vector<16x128xf32>
    %cst = arith.constant dense<0.000000e+00> : vector<64x128xf32>
    %2 = tpu.matmul %0, %1, %cst {dimension_numbers = #tpu.dot_dimension_numbers<[1], [0], [0], [1], [0, 0, 1, 1], [], []>} : vector<64x16xf32>, vector<16x128xf32>, vector<64x128xf32> -> vector<64x128xf32>
    %c0_3 = arith.constant 0 : index
    %c0_4 = arith.constant 0 : index
    %3 = vector.load %arg3[%c0_3, %c0_4] : memref<1x128xf32, #tpu.memory_space<vmem>>, vector<1x128xf32>
    %4 = vector.broadcast %3 : vector<1x128xf32> to vector<64x128xf32>
    %5 = arith.addf %2, %4 : vector<64x128xf32>
    %c0_5 = arith.constant 0 : index
    %c0_6 = arith.constant 0 : index
    %6 = vector.load %arg4[%c0_5, %c0_6] : memref<64x128xf32, #tpu.memory_space<vmem>>, vector<64x128xf32>
    tpu.vector_store %arg4[%c0_5, %c0_6], %5 {strides = array<i32>} : memref<64x128xf32, #tpu.memory_space<vmem>>, vector<64x128xf32>,
    return
  }
  func.func @transform_0(%arg0: i32) -> (i32, i32) {
    %c0_i32 = arith.constant 0 : i32
    %c0_i32_0 = arith.constant 0 : i32
    return %arg0, %c0_i32 : i32, i32
  }
  func.func @transform_1(%arg0: i32) -> (i32, i32) {
    %c0_i32 = arith.constant 0 : i32
    %c0_i32_0 = arith.constant 0 : i32
    %c0_i32_1 = arith.constant 0 : i32
    return %c0_i32, %c0_i32_0 : i32, i32
  }
  func.func @transform_2(%arg0: i32) -> (i32, i32) {
    %c0_i32 = arith.constant 0 : i32
    %c0_i32_0 = arith.constant 0 : i32
    %c0_i32_1 = arith.constant 0 : i32
    return %c0_i32, %c0_i32_0 : i32, i32
  }
  func.func @transform_3(%arg0: i32) -> (i32, i32) {
    %c0_i32 = arith.constant 0 : i32
    %c0_i32_0 = arith.constant 0 : i32
    return %arg0, %c0_i32 : i32, i32
  }
}

module attributes {stable_mosaic.version = 11 : i64} {
  func.func @_fused_rnn_kernel(%arg0: i32, %arg1: memref<4x8x128xf32, #tpu.memory_space<vmem>>, %arg2: memref<2x128x128xf32, #tpu.memory_space<vmem>>, %arg3: memref<2x128x128xf32, #tpu.memory_space<vmem>>, %arg4: memref<2x1x128xf32, #tpu.memory_space<vmem>>, %arg5: memref<4x8x128xf32, #tpu.memory_space<vmem>>, %arg6: memref<2x8x128xf32, #tpu.memory_space<vmem>>) attributes {dimension_semantics = [#tpu.dimension_semantics<arbitrary>], iteration_bounds = array<i64: 2>, scalar_prefetch = 0 : i64, scratch_operands = 1 : i64, tpu.core_type = #tpu.core_type<tc>, window_params = [{transform_indices = @transform_0, window_bounds = array<i64: 4, 8, 128>}, {pipeline_mode = #tpu.pipeline_mode<synchronous>, transform_indices = @transform_1, window_bounds = array<i64: 2, 128, 128>}, {pipeline_mode = #tpu.pipeline_mode<synchronous>, transform_indices = @transform_2, window_bounds = array<i64: 2, 128, 128>}, {pipeline_mode = #tpu.pipeline_mode<synchronous>, transform_indices = @transform_3, window_bounds = array<i64: 2, 1, 128>}, {transform_indices = @transform_4, window_bounds = array<i64: 4, 8, 128>}]} {
    %c0_i32 = arith.constant 0 : i32
    %0 = arith.cmpi eq, %arg0, %c0_i32 : i32
    %1 = arith.extui %0 : i1 to i32
    %c0_i32_0 = arith.constant 0 : i32
    %2 = arith.cmpi ne, %1, %c0_i32_0 : i32
    scf.if %2 {
      %cst_123 = arith.constant 0.000000e+00 : f32
      %139 = vector.broadcast %cst_123 : f32 to vector<2x8x128xf32>
      %c0_124 = arith.constant 0 : index
      %c0_125 = arith.constant 0 : index
      %c0_126 = arith.constant 0 : index
      %140 = vector.load %arg6[%c0_124, %c0_125, %c0_126] : memref<2x8x128xf32, #tpu.memory_space<vmem>>, vector<2x8x128xf32>
      tpu.vector_store %arg6[%c0_124, %c0_125, %c0_126], %139 {strides = array<i32>} : memref<2x8x128xf32, #tpu.memory_space<vmem>>, vector<2x8x128xf32>,
    } else {
    }
    %c0_i32_1 = arith.constant 0 : i32
    %3 = arith.index_cast %c0_i32_1 : i32 to index
    %c0 = arith.constant 0 : index
    %c0_2 = arith.constant 0 : index
    %4 = vector.load %arg1[%3, %c0, %c0_2] : memref<4x8x128xf32, #tpu.memory_space<vmem>>, vector<1x8x128xf32>
    %5 = vector.shape_cast %4 : vector<1x8x128xf32> to vector<8x128xf32>
    %c0_3 = arith.constant 0 : index
    %c0_4 = arith.constant 0 : index
    %c0_5 = arith.constant 0 : index
    %6 = vector.load %arg6[%c0_3, %c0_4, %c0_5] : memref<2x8x128xf32, #tpu.memory_space<vmem>>, vector<1x8x128xf32>
    %7 = vector.shape_cast %6 : vector<1x8x128xf32> to vector<8x128xf32>
    %c0_6 = arith.constant 0 : index
    %c0_7 = arith.constant 0 : index
    %c0_8 = arith.constant 0 : index
    %8 = vector.load %arg3[%c0_6, %c0_7, %c0_8] : memref<2x128x128xf32, #tpu.memory_space<vmem>>, vector<1x128x128xf32>
    %9 = vector.shape_cast %8 : vector<1x128x128xf32> to vector<128x128xf32>
    %cst = arith.constant dense<0.000000e+00> : vector<8x128xf32>
    %10 = tpu.matmul %7, %9, %cst {dimension_numbers = #tpu.dot_dimension_numbers<[1], [0], [0], [1], [0, 0, 1, 1], [], []>} : vector<8x128xf32>, vector<128x128xf32>, vector<8x128xf32> -> vector<8x128xf32>
    %11 = arith.addf %5, %10 : vector<8x128xf32>
    %12 = math.tanh %11 : vector<8x128xf32>
    %c0_9 = arith.constant 0 : index
    %c0_10 = arith.constant 0 : index
    %c0_11 = arith.constant 0 : index
    %13 = vector.load %arg6[%c0_9, %c0_10, %c0_11] : memref<2x8x128xf32, #tpu.memory_space<vmem>>, vector<1x8x128xf32>
    %14 = vector.shape_cast %13 : vector<1x8x128xf32> to vector<8x128xf32>
    %15 = vector.shape_cast %12 : vector<8x128xf32> to vector<1x8x128xf32>
    tpu.vector_store %arg6[%c0_9, %c0_10, %c0_11], %15 {strides = array<i32>} : memref<2x8x128xf32, #tpu.memory_space<vmem>>, vector<1x8x128xf32>,
    %c1 = arith.constant 1 : index
    %c0_12 = arith.constant 0 : index
    %c0_13 = arith.constant 0 : index
    %16 = vector.load %arg2[%c1, %c0_12, %c0_13] : memref<2x128x128xf32, #tpu.memory_space<vmem>>, vector<1x128x128xf32>
    %17 = vector.shape_cast %16 : vector<1x128x128xf32> to vector<128x128xf32>
    %cst_14 = arith.constant dense<0.000000e+00> : vector<8x128xf32>
    %18 = tpu.matmul %12, %17, %cst_14 {dimension_numbers = #tpu.dot_dimension_numbers<[1], [0], [0], [1], [0, 0, 1, 1], [], []>} : vector<8x128xf32>, vector<128x128xf32>, vector<8x128xf32> -> vector<8x128xf32>
    %c1_15 = arith.constant 1 : index
    %c0_16 = arith.constant 0 : index
    %c0_17 = arith.constant 0 : index
    %19 = vector.load %arg6[%c1_15, %c0_16, %c0_17] : memref<2x8x128xf32, #tpu.memory_space<vmem>>, vector<1x8x128xf32>
    %20 = vector.shape_cast %19 : vector<1x8x128xf32> to vector<8x128xf32>
    %c1_18 = arith.constant 1 : index
    %c0_19 = arith.constant 0 : index
    %c0_20 = arith.constant 0 : index
    %21 = vector.load %arg3[%c1_18, %c0_19, %c0_20] : memref<2x128x128xf32, #tpu.memory_space<vmem>>, vector<1x128x128xf32>
    %22 = vector.shape_cast %21 : vector<1x128x128xf32> to vector<128x128xf32>
    %cst_21 = arith.constant dense<0.000000e+00> : vector<8x128xf32>
    %23 = tpu.matmul %20, %22, %cst_21 {dimension_numbers = #tpu.dot_dimension_numbers<[1], [0], [0], [1], [0, 0, 1, 1], [], []>} : vector<8x128xf32>, vector<128x128xf32>, vector<8x128xf32> -> vector<8x128xf32>
    %24 = arith.addf %18, %23 : vector<8x128xf32>
    %c1_22 = arith.constant 1 : index
    %c0_23 = arith.constant 0 : index
    %c0_24 = arith.constant 0 : index
    %25 = vector.load %arg4[%c1_22, %c0_23, %c0_24] : memref<2x1x128xf32, #tpu.memory_space<vmem>>, vector<1x1x128xf32>
    %26 = vector.shape_cast %25 : vector<1x1x128xf32> to vector<1x128xf32>
    %27 = vector.broadcast %26 : vector<1x128xf32> to vector<8x128xf32>
    %28 = arith.addf %24, %27 : vector<8x128xf32>
    %29 = math.tanh %28 : vector<8x128xf32>
    %c1_25 = arith.constant 1 : index
    %c0_26 = arith.constant 0 : index
    %c0_27 = arith.constant 0 : index
    %30 = vector.load %arg6[%c1_25, %c0_26, %c0_27] : memref<2x8x128xf32, #tpu.memory_space<vmem>>, vector<1x8x128xf32>
    %31 = vector.shape_cast %30 : vector<1x8x128xf32> to vector<8x128xf32>
    %32 = vector.shape_cast %29 : vector<8x128xf32> to vector<1x8x128xf32>
    tpu.vector_store %arg6[%c1_25, %c0_26, %c0_27], %32 {strides = array<i32>} : memref<2x8x128xf32, #tpu.memory_space<vmem>>, vector<1x8x128xf32>,
    %33 = arith.index_cast %c0_i32_1 : i32 to index
    %c0_28 = arith.constant 0 : index
    %c0_29 = arith.constant 0 : index
    %34 = vector.load %arg5[%33, %c0_28, %c0_29] : memref<4x8x128xf32, #tpu.memory_space<vmem>>, vector<1x8x128xf32>
    %35 = vector.shape_cast %34 : vector<1x8x128xf32> to vector<8x128xf32>
    %36 = vector.shape_cast %29 : vector<8x128xf32> to vector<1x8x128xf32>
    tpu.vector_store %arg5[%33, %c0_28, %c0_29], %36 {strides = array<i32>} : memref<4x8x128xf32, #tpu.memory_space<vmem>>, vector<1x8x128xf32>,
    %c1_i32 = arith.constant 1 : i32
    %37 = arith.index_cast %c1_i32 : i32 to index
    %c0_30 = arith.constant 0 : index
    %c0_31 = arith.constant 0 : index
    %38 = vector.load %arg1[%37, %c0_30, %c0_31] : memref<4x8x128xf32, #tpu.memory_space<vmem>>, vector<1x8x128xf32>
    %39 = vector.shape_cast %38 : vector<1x8x128xf32> to vector<8x128xf32>
    %c0_32 = arith.constant 0 : index
    %c0_33 = arith.constant 0 : index
    %c0_34 = arith.constant 0 : index
    %40 = vector.load %arg6[%c0_32, %c0_33, %c0_34] : memref<2x8x128xf32, #tpu.memory_space<vmem>>, vector<1x8x128xf32>
    %41 = vector.shape_cast %40 : vector<1x8x128xf32> to vector<8x128xf32>
    %c0_35 = arith.constant 0 : index
    %c0_36 = arith.constant 0 : index
    %c0_37 = arith.constant 0 : index
    %42 = vector.load %arg3[%c0_35, %c0_36, %c0_37] : memref<2x128x128xf32, #tpu.memory_space<vmem>>, vector<1x128x128xf32>
    %43 = vector.shape_cast %42 : vector<1x128x128xf32> to vector<128x128xf32>
    %cst_38 = arith.constant dense<0.000000e+00> : vector<8x128xf32>
    %44 = tpu.matmul %41, %43, %cst_38 {dimension_numbers = #tpu.dot_dimension_numbers<[1], [0], [0], [1], [0, 0, 1, 1], [], []>} : vector<8x128xf32>, vector<128x128xf32>, vector<8x128xf32> -> vector<8x128xf32>
    %45 = arith.addf %39, %44 : vector<8x128xf32>
    %46 = math.tanh %45 : vector<8x128xf32>
    %c0_39 = arith.constant 0 : index
    %c0_40 = arith.constant 0 : index
    %c0_41 = arith.constant 0 : index
    %47 = vector.load %arg6[%c0_39, %c0_40, %c0_41] : memref<2x8x128xf32, #tpu.memory_space<vmem>>, vector<1x8x128xf32>
    %48 = vector.shape_cast %47 : vector<1x8x128xf32> to vector<8x128xf32>
    %49 = vector.shape_cast %46 : vector<8x128xf32> to vector<1x8x128xf32>
    tpu.vector_store %arg6[%c0_39, %c0_40, %c0_41], %49 {strides = array<i32>} : memref<2x8x128xf32, #tpu.memory_space<vmem>>, vector<1x8x128xf32>,
    %c1_42 = arith.constant 1 : index
    %c0_43 = arith.constant 0 : index
    %c0_44 = arith.constant 0 : index
    %50 = vector.load %arg2[%c1_42, %c0_43, %c0_44] : memref<2x128x128xf32, #tpu.memory_space<vmem>>, vector<1x128x128xf32>
    %51 = vector.shape_cast %50 : vector<1x128x128xf32> to vector<128x128xf32>
    %cst_45 = arith.constant dense<0.000000e+00> : vector<8x128xf32>
    %52 = tpu.matmul %46, %51, %cst_45 {dimension_numbers = #tpu.dot_dimension_numbers<[1], [0], [0], [1], [0, 0, 1, 1], [], []>} : vector<8x128xf32>, vector<128x128xf32>, vector<8x128xf32> -> vector<8x128xf32>
    %c1_46 = arith.constant 1 : index
    %c0_47 = arith.constant 0 : index
    %c0_48 = arith.constant 0 : index
    %53 = vector.load %arg6[%c1_46, %c0_47, %c0_48] : memref<2x8x128xf32, #tpu.memory_space<vmem>>, vector<1x8x128xf32>
    %54 = vector.shape_cast %53 : vector<1x8x128xf32> to vector<8x128xf32>
    %c1_49 = arith.constant 1 : index
    %c0_50 = arith.constant 0 : index
    %c0_51 = arith.constant 0 : index
    %55 = vector.load %arg3[%c1_49, %c0_50, %c0_51] : memref<2x128x128xf32, #tpu.memory_space<vmem>>, vector<1x128x128xf32>
    %56 = vector.shape_cast %55 : vector<1x128x128xf32> to vector<128x128xf32>
    %cst_52 = arith.constant dense<0.000000e+00> : vector<8x128xf32>
    %57 = tpu.matmul %54, %56, %cst_52 {dimension_numbers = #tpu.dot_dimension_numbers<[1], [0], [0], [1], [0, 0, 1, 1], [], []>} : vector<8x128xf32>, vector<128x128xf32>, vector<8x128xf32> -> vector<8x128xf32>
    %58 = arith.addf %52, %57 : vector<8x128xf32>
    %c1_53 = arith.constant 1 : index
    %c0_54 = arith.constant 0 : index
    %c0_55 = arith.constant 0 : index
    %59 = vector.load %arg4[%c1_53, %c0_54, %c0_55] : memref<2x1x128xf32, #tpu.memory_space<vmem>>, vector<1x1x128xf32>
    %60 = vector.shape_cast %59 : vector<1x1x128xf32> to vector<1x128xf32>
    %61 = vector.broadcast %60 : vector<1x128xf32> to vector<8x128xf32>
    %62 = arith.addf %58, %61 : vector<8x128xf32>
    %63 = math.tanh %62 : vector<8x128xf32>
    %c1_56 = arith.constant 1 : index
    %c0_57 = arith.constant 0 : index
    %c0_58 = arith.constant 0 : index
    %64 = vector.load %arg6[%c1_56, %c0_57, %c0_58] : memref<2x8x128xf32, #tpu.memory_space<vmem>>, vector<1x8x128xf32>
    %65 = vector.shape_cast %64 : vector<1x8x128xf32> to vector<8x128xf32>
    %66 = vector.shape_cast %63 : vector<8x128xf32> to vector<1x8x128xf32>
    tpu.vector_store %arg6[%c1_56, %c0_57, %c0_58], %66 {strides = array<i32>} : memref<2x8x128xf32, #tpu.memory_space<vmem>>, vector<1x8x128xf32>,
    %67 = arith.index_cast %c1_i32 : i32 to index
    %c0_59 = arith.constant 0 : index
    %c0_60 = arith.constant 0 : index
    %68 = vector.load %arg5[%67, %c0_59, %c0_60] : memref<4x8x128xf32, #tpu.memory_space<vmem>>, vector<1x8x128xf32>
    %69 = vector.shape_cast %68 : vector<1x8x128xf32> to vector<8x128xf32>
    %70 = vector.shape_cast %63 : vector<8x128xf32> to vector<1x8x128xf32>
    tpu.vector_store %arg5[%67, %c0_59, %c0_60], %70 {strides = array<i32>} : memref<4x8x128xf32, #tpu.memory_space<vmem>>, vector<1x8x128xf32>,
    %c2_i32 = arith.constant 2 : i32
    %71 = arith.index_cast %c2_i32 : i32 to index
    %c0_61 = arith.constant 0 : index
    %c0_62 = arith.constant 0 : index
    %72 = vector.load %arg1[%71, %c0_61, %c0_62] : memref<4x8x128xf32, #tpu.memory_space<vmem>>, vector<1x8x128xf32>
    %73 = vector.shape_cast %72 : vector<1x8x128xf32> to vector<8x128xf32>
    %c0_63 = arith.constant 0 : index
    %c0_64 = arith.constant 0 : index
    %c0_65 = arith.constant 0 : index
    %74 = vector.load %arg6[%c0_63, %c0_64, %c0_65] : memref<2x8x128xf32, #tpu.memory_space<vmem>>, vector<1x8x128xf32>
    %75 = vector.shape_cast %74 : vector<1x8x128xf32> to vector<8x128xf32>
    %c0_66 = arith.constant 0 : index
    %c0_67 = arith.constant 0 : index
    %c0_68 = arith.constant 0 : index
    %76 = vector.load %arg3[%c0_66, %c0_67, %c0_68] : memref<2x128x128xf32, #tpu.memory_space<vmem>>, vector<1x128x128xf32>
    %77 = vector.shape_cast %76 : vector<1x128x128xf32> to vector<128x128xf32>
    %cst_69 = arith.constant dense<0.000000e+00> : vector<8x128xf32>
    %78 = tpu.matmul %75, %77, %cst_69 {dimension_numbers = #tpu.dot_dimension_numbers<[1], [0], [0], [1], [0, 0, 1, 1], [], []>} : vector<8x128xf32>, vector<128x128xf32>, vector<8x128xf32> -> vector<8x128xf32>
    %79 = arith.addf %73, %78 : vector<8x128xf32>
    %80 = math.tanh %79 : vector<8x128xf32>
    %c0_70 = arith.constant 0 : index
    %c0_71 = arith.constant 0 : index
    %c0_72 = arith.constant 0 : index
    %81 = vector.load %arg6[%c0_70, %c0_71, %c0_72] : memref<2x8x128xf32, #tpu.memory_space<vmem>>, vector<1x8x128xf32>
    %82 = vector.shape_cast %81 : vector<1x8x128xf32> to vector<8x128xf32>
    %83 = vector.shape_cast %80 : vector<8x128xf32> to vector<1x8x128xf32>
    tpu.vector_store %arg6[%c0_70, %c0_71, %c0_72], %83 {strides = array<i32>} : memref<2x8x128xf32, #tpu.memory_space<vmem>>, vector<1x8x128xf32>,
    %c1_73 = arith.constant 1 : index
    %c0_74 = arith.constant 0 : index
    %c0_75 = arith.constant 0 : index
    %84 = vector.load %arg2[%c1_73, %c0_74, %c0_75] : memref<2x128x128xf32, #tpu.memory_space<vmem>>, vector<1x128x128xf32>
    %85 = vector.shape_cast %84 : vector<1x128x128xf32> to vector<128x128xf32>
    %cst_76 = arith.constant dense<0.000000e+00> : vector<8x128xf32>
    %86 = tpu.matmul %80, %85, %cst_76 {dimension_numbers = #tpu.dot_dimension_numbers<[1], [0], [0], [1], [0, 0, 1, 1], [], []>} : vector<8x128xf32>, vector<128x128xf32>, vector<8x128xf32> -> vector<8x128xf32>
    %c1_77 = arith.constant 1 : index
    %c0_78 = arith.constant 0 : index
    %c0_79 = arith.constant 0 : index
    %87 = vector.load %arg6[%c1_77, %c0_78, %c0_79] : memref<2x8x128xf32, #tpu.memory_space<vmem>>, vector<1x8x128xf32>
    %88 = vector.shape_cast %87 : vector<1x8x128xf32> to vector<8x128xf32>
    %c1_80 = arith.constant 1 : index
    %c0_81 = arith.constant 0 : index
    %c0_82 = arith.constant 0 : index
    %89 = vector.load %arg3[%c1_80, %c0_81, %c0_82] : memref<2x128x128xf32, #tpu.memory_space<vmem>>, vector<1x128x128xf32>
    %90 = vector.shape_cast %89 : vector<1x128x128xf32> to vector<128x128xf32>
    %cst_83 = arith.constant dense<0.000000e+00> : vector<8x128xf32>
    %91 = tpu.matmul %88, %90, %cst_83 {dimension_numbers = #tpu.dot_dimension_numbers<[1], [0], [0], [1], [0, 0, 1, 1], [], []>} : vector<8x128xf32>, vector<128x128xf32>, vector<8x128xf32> -> vector<8x128xf32>
    %92 = arith.addf %86, %91 : vector<8x128xf32>
    %c1_84 = arith.constant 1 : index
    %c0_85 = arith.constant 0 : index
    %c0_86 = arith.constant 0 : index
    %93 = vector.load %arg4[%c1_84, %c0_85, %c0_86] : memref<2x1x128xf32, #tpu.memory_space<vmem>>, vector<1x1x128xf32>
    %94 = vector.shape_cast %93 : vector<1x1x128xf32> to vector<1x128xf32>
    %95 = vector.broadcast %94 : vector<1x128xf32> to vector<8x128xf32>
    %96 = arith.addf %92, %95 : vector<8x128xf32>
    %97 = math.tanh %96 : vector<8x128xf32>
    %c1_87 = arith.constant 1 : index
    %c0_88 = arith.constant 0 : index
    %c0_89 = arith.constant 0 : index
    %98 = vector.load %arg6[%c1_87, %c0_88, %c0_89] : memref<2x8x128xf32, #tpu.memory_space<vmem>>, vector<1x8x128xf32>
    %99 = vector.shape_cast %98 : vector<1x8x128xf32> to vector<8x128xf32>
    %100 = vector.shape_cast %97 : vector<8x128xf32> to vector<1x8x128xf32>
    tpu.vector_store %arg6[%c1_87, %c0_88, %c0_89], %100 {strides = array<i32>} : memref<2x8x128xf32, #tpu.memory_space<vmem>>, vector<1x8x128xf32>,
    %101 = arith.index_cast %c2_i32 : i32 to index
    %c0_90 = arith.constant 0 : index
    %c0_91 = arith.constant 0 : index
    %102 = vector.load %arg5[%101, %c0_90, %c0_91] : memref<4x8x128xf32, #tpu.memory_space<vmem>>, vector<1x8x128xf32>
    %103 = vector.shape_cast %102 : vector<1x8x128xf32> to vector<8x128xf32>
    %104 = vector.shape_cast %97 : vector<8x128xf32> to vector<1x8x128xf32>
    tpu.vector_store %arg5[%101, %c0_90, %c0_91], %104 {strides = array<i32>} : memref<4x8x128xf32, #tpu.memory_space<vmem>>, vector<1x8x128xf32>,
    %c3_i32 = arith.constant 3 : i32
    %105 = arith.index_cast %c3_i32 : i32 to index
    %c0_92 = arith.constant 0 : index
    %c0_93 = arith.constant 0 : index
    %106 = vector.load %arg1[%105, %c0_92, %c0_93] : memref<4x8x128xf32, #tpu.memory_space<vmem>>, vector<1x8x128xf32>
    %107 = vector.shape_cast %106 : vector<1x8x128xf32> to vector<8x128xf32>
    %c0_94 = arith.constant 0 : index
    %c0_95 = arith.constant 0 : index
    %c0_96 = arith.constant 0 : index
    %108 = vector.load %arg6[%c0_94, %c0_95, %c0_96] : memref<2x8x128xf32, #tpu.memory_space<vmem>>, vector<1x8x128xf32>
    %109 = vector.shape_cast %108 : vector<1x8x128xf32> to vector<8x128xf32>
    %c0_97 = arith.constant 0 : index
    %c0_98 = arith.constant 0 : index
    %c0_99 = arith.constant 0 : index
    %110 = vector.load %arg3[%c0_97, %c0_98, %c0_99] : memref<2x128x128xf32, #tpu.memory_space<vmem>>, vector<1x128x128xf32>
    %111 = vector.shape_cast %110 : vector<1x128x128xf32> to vector<128x128xf32>
    %cst_100 = arith.constant dense<0.000000e+00> : vector<8x128xf32>
    %112 = tpu.matmul %109, %111, %cst_100 {dimension_numbers = #tpu.dot_dimension_numbers<[1], [0], [0], [1], [0, 0, 1, 1], [], []>} : vector<8x128xf32>, vector<128x128xf32>, vector<8x128xf32> -> vector<8x128xf32>
    %113 = arith.addf %107, %112 : vector<8x128xf32>
    %114 = math.tanh %113 : vector<8x128xf32>
    %c0_101 = arith.constant 0 : index
    %c0_102 = arith.constant 0 : index
    %c0_103 = arith.constant 0 : index
    %115 = vector.load %arg6[%c0_101, %c0_102, %c0_103] : memref<2x8x128xf32, #tpu.memory_space<vmem>>, vector<1x8x128xf32>
    %116 = vector.shape_cast %115 : vector<1x8x128xf32> to vector<8x128xf32>
    %117 = vector.shape_cast %114 : vector<8x128xf32> to vector<1x8x128xf32>
    tpu.vector_store %arg6[%c0_101, %c0_102, %c0_103], %117 {strides = array<i32>} : memref<2x8x128xf32, #tpu.memory_space<vmem>>, vector<1x8x128xf32>,
    %c1_104 = arith.constant 1 : index
    %c0_105 = arith.constant 0 : index
    %c0_106 = arith.constant 0 : index
    %118 = vector.load %arg2[%c1_104, %c0_105, %c0_106] : memref<2x128x128xf32, #tpu.memory_space<vmem>>, vector<1x128x128xf32>
    %119 = vector.shape_cast %118 : vector<1x128x128xf32> to vector<128x128xf32>
    %cst_107 = arith.constant dense<0.000000e+00> : vector<8x128xf32>
    %120 = tpu.matmul %114, %119, %cst_107 {dimension_numbers = #tpu.dot_dimension_numbers<[1], [0], [0], [1], [0, 0, 1, 1], [], []>} : vector<8x128xf32>, vector<128x128xf32>, vector<8x128xf32> -> vector<8x128xf32>
    %c1_108 = arith.constant 1 : index
    %c0_109 = arith.constant 0 : index
    %c0_110 = arith.constant 0 : index
    %121 = vector.load %arg6[%c1_108, %c0_109, %c0_110] : memref<2x8x128xf32, #tpu.memory_space<vmem>>, vector<1x8x128xf32>
    %122 = vector.shape_cast %121 : vector<1x8x128xf32> to vector<8x128xf32>
    %c1_111 = arith.constant 1 : index
    %c0_112 = arith.constant 0 : index
    %c0_113 = arith.constant 0 : index
    %123 = vector.load %arg3[%c1_111, %c0_112, %c0_113] : memref<2x128x128xf32, #tpu.memory_space<vmem>>, vector<1x128x128xf32>
    %124 = vector.shape_cast %123 : vector<1x128x128xf32> to vector<128x128xf32>
    %cst_114 = arith.constant dense<0.000000e+00> : vector<8x128xf32>
    %125 = tpu.matmul %122, %124, %cst_114 {dimension_numbers = #tpu.dot_dimension_numbers<[1], [0], [0], [1], [0, 0, 1, 1], [], []>} : vector<8x128xf32>, vector<128x128xf32>, vector<8x128xf32> -> vector<8x128xf32>
    %126 = arith.addf %120, %125 : vector<8x128xf32>
    %c1_115 = arith.constant 1 : index
    %c0_116 = arith.constant 0 : index
    %c0_117 = arith.constant 0 : index
    %127 = vector.load %arg4[%c1_115, %c0_116, %c0_117] : memref<2x1x128xf32, #tpu.memory_space<vmem>>, vector<1x1x128xf32>
    %128 = vector.shape_cast %127 : vector<1x1x128xf32> to vector<1x128xf32>
    %129 = vector.broadcast %128 : vector<1x128xf32> to vector<8x128xf32>
    %130 = arith.addf %126, %129 : vector<8x128xf32>
    %131 = math.tanh %130 : vector<8x128xf32>
    %c1_118 = arith.constant 1 : index
    %c0_119 = arith.constant 0 : index
    %c0_120 = arith.constant 0 : index
    %132 = vector.load %arg6[%c1_118, %c0_119, %c0_120] : memref<2x8x128xf32, #tpu.memory_space<vmem>>, vector<1x8x128xf32>
    %133 = vector.shape_cast %132 : vector<1x8x128xf32> to vector<8x128xf32>
    %134 = vector.shape_cast %131 : vector<8x128xf32> to vector<1x8x128xf32>
    tpu.vector_store %arg6[%c1_118, %c0_119, %c0_120], %134 {strides = array<i32>} : memref<2x8x128xf32, #tpu.memory_space<vmem>>, vector<1x8x128xf32>,
    %135 = arith.index_cast %c3_i32 : i32 to index
    %c0_121 = arith.constant 0 : index
    %c0_122 = arith.constant 0 : index
    %136 = vector.load %arg5[%135, %c0_121, %c0_122] : memref<4x8x128xf32, #tpu.memory_space<vmem>>, vector<1x8x128xf32>
    %137 = vector.shape_cast %136 : vector<1x8x128xf32> to vector<8x128xf32>
    %138 = vector.shape_cast %131 : vector<8x128xf32> to vector<1x8x128xf32>
    tpu.vector_store %arg5[%135, %c0_121, %c0_122], %138 {strides = array<i32>} : memref<4x8x128xf32, #tpu.memory_space<vmem>>, vector<1x8x128xf32>,
    %c4_i32 = arith.constant 4 : i32
    return
  }
  func.func @transform_0(%arg0: i32) -> (i32, i32, i32) {
    %c0_i32 = arith.constant 0 : i32
    %c0_i32_0 = arith.constant 0 : i32
    %c0_i32_1 = arith.constant 0 : i32
    return %arg0, %c0_i32, %c0_i32_0 : i32, i32, i32
  }
  func.func @transform_1(%arg0: i32) -> (i32, i32, i32) {
    %c0_i32 = arith.constant 0 : i32
    %c0_i32_0 = arith.constant 0 : i32
    %c0_i32_1 = arith.constant 0 : i32
    %c0_i32_2 = arith.constant 0 : i32
    return %c0_i32, %c0_i32_0, %c0_i32_1 : i32, i32, i32
  }
  func.func @transform_2(%arg0: i32) -> (i32, i32, i32) {
    %c0_i32 = arith.constant 0 : i32
    %c0_i32_0 = arith.constant 0 : i32
    %c0_i32_1 = arith.constant 0 : i32
    %c0_i32_2 = arith.constant 0 : i32
    return %c0_i32, %c0_i32_0, %c0_i32_1 : i32, i32, i32
  }
  func.func @transform_3(%arg0: i32) -> (i32, i32, i32) {
    %c0_i32 = arith.constant 0 : i32
    %c0_i32_0 = arith.constant 0 : i32
    %c0_i32_1 = arith.constant 0 : i32
    %c0_i32_2 = arith.constant 0 : i32
    return %c0_i32, %c0_i32_0, %c0_i32_1 : i32, i32, i32
  }
  func.func @transform_4(%arg0: i32) -> (i32, i32, i32) {
    %c0_i32 = arith.constant 0 : i32
    %c0_i32_0 = arith.constant 0 : i32
    %c0_i32_1 = arith.constant 0 : i32
    return %arg0, %c0_i32, %c0_i32_0 : i32, i32, i32
  }
}

module attributes {stable_mosaic.version = 11 : i64} {
  func.func @_matmul_bias_kernel(%arg0: i32, %arg1: memref<64x128xf32, #tpu.memory_space<vmem>>, %arg2: memref<128x128xf32, #tpu.memory_space<vmem>>, %arg3: memref<1x128xf32, #tpu.memory_space<vmem>>, %arg4: memref<64x128xf32, #tpu.memory_space<vmem>>) attributes {dimension_semantics = [#tpu.dimension_semantics<parallel>], iteration_bounds = array<i64: 1>, scalar_prefetch = 0 : i64, scratch_operands = 0 : i64, tpu.core_type = #tpu.core_type<tc>, window_params = [{transform_indices = @transform_0, window_bounds = array<i64: 64, 128>}, {pipeline_mode = #tpu.pipeline_mode<synchronous>, transform_indices = @transform_1, window_bounds = array<i64: 128, 128>}, {pipeline_mode = #tpu.pipeline_mode<synchronous>, transform_indices = @transform_2, window_bounds = array<i64: 1, 128>}, {transform_indices = @transform_3, window_bounds = array<i64: 64, 128>}]} {
    %c0 = arith.constant 0 : index
    %c0_0 = arith.constant 0 : index
    %0 = vector.load %arg1[%c0, %c0_0] : memref<64x128xf32, #tpu.memory_space<vmem>>, vector<64x128xf32>
    %c0_1 = arith.constant 0 : index
    %c0_2 = arith.constant 0 : index
    %1 = vector.load %arg2[%c0_1, %c0_2] : memref<128x128xf32, #tpu.memory_space<vmem>>, vector<128x128xf32>
    %cst = arith.constant dense<0.000000e+00> : vector<64x128xf32>
    %2 = tpu.matmul %0, %1, %cst {dimension_numbers = #tpu.dot_dimension_numbers<[1], [0], [0], [1], [0, 0, 1, 1], [], []>} : vector<64x128xf32>, vector<128x128xf32>, vector<64x128xf32> -> vector<64x128xf32>
    %c0_3 = arith.constant 0 : index
    %c0_4 = arith.constant 0 : index
    %3 = vector.load %arg3[%c0_3, %c0_4] : memref<1x128xf32, #tpu.memory_space<vmem>>, vector<1x128xf32>
    %4 = vector.broadcast %3 : vector<1x128xf32> to vector<64x128xf32>
    %5 = arith.addf %2, %4 : vector<64x128xf32>
    %c0_5 = arith.constant 0 : index
    %c0_6 = arith.constant 0 : index
    %6 = vector.load %arg4[%c0_5, %c0_6] : memref<64x128xf32, #tpu.memory_space<vmem>>, vector<64x128xf32>
    tpu.vector_store %arg4[%c0_5, %c0_6], %5 {strides = array<i32>} : memref<64x128xf32, #tpu.memory_space<vmem>>, vector<64x128xf32>,
    return
  }
  func.func @transform_0(%arg0: i32) -> (i32, i32) {
    %c0_i32 = arith.constant 0 : i32
    %c0_i32_0 = arith.constant 0 : i32
    return %arg0, %c0_i32 : i32, i32
  }
  func.func @transform_1(%arg0: i32) -> (i32, i32) {
    %c0_i32 = arith.constant 0 : i32
    %c0_i32_0 = arith.constant 0 : i32
    %c0_i32_1 = arith.constant 0 : i32
    return %c0_i32, %c0_i32_0 : i32, i32
  }
  func.func @transform_2(%arg0: i32) -> (i32, i32) {
    %c0_i32 = arith.constant 0 : i32
    %c0_i32_0 = arith.constant 0 : i32
    %c0_i32_1 = arith.constant 0 : i32
    return %c0_i32, %c0_i32_0 : i32, i32
  }
  func.func @transform_3(%arg0: i32) -> (i32, i32) {
    %c0_i32 = arith.constant 0 : i32
    %c0_i32_0 = arith.constant 0 : i32
    return %arg0, %c0_i32 : i32, i32
  }
}

</mosaic_0001>

<bundles_post_ra>
// kernel: forward.3
= control target key start
LH: loop header
LB: loop body
LE: loop exit
PB: predicated region body
PF: predicated region fallthrough
CT: control target
= control target key end

     0   :  { %vm31_vm0 = vcmask 130048   ;;  %s299_s1 = inlined_call_operand.vmem [shape: f32[16,128], index: 1, kind: input, shape index: {}]   ;;  %s300_s0 = inlined_call_operand.vmem [shape: f32[64,16], index: 0, kind: input, shape index: {}]   ;;  %s301_s2 = inlined_call_operand.vmem [shape: f32[1,128], index: 2, kind: input, shape index: {}]   ;;  %s302_s3 = inlined_call_operand.vmem [shape: f32[64,128], index: 3, kind: output, shape index: {}]  }
   0x1   :  { %v22_v0 = vld [vmem:[%s299_s1] sm:$0xff]  ;;  %v23_v1 = vld [vmem:[%s299_s1 + $0x8] sm:$0xff]  ;;  %v16_v7 = vld [vmem:[%s300_s0 + $0x10] sm:$0xff] }
   0x2   :  { %v14_v2 = vld [vmem:[%s300_s0] sm:$0xff]  ;;  %v208_v3 = vpack.c.bf16 %v23_v1, %v22_v0  ;;  %v15_v5 = vld [vmem:[%s300_s0 + $0x8] sm:$0xff]  ;;  %v20_v8 = vld [vmem:[%s300_s0 + $0x30] sm:$0xff] }
   0x3   :  { %196 = vmatprep.mubr.msk.f32.mxu0 %vm31_vm0, %v14_v2  ;;  %v18_v4 = vld [vmem:[%s300_s0 + $0x20] sm:$0xff]  ;;  %v19_v6 = vld [vmem:[%s300_s0 + $0x28] sm:$0xff]  ;;  %v17_v9 = vld [vmem:[%s300_s0 + $0x18] sm:$0xff] }
   0x4   :  { %202 = vmatprep.mubr.msk.f32.mxu1 %vm31_vm0, %v18_v4  ;;  %209 = vmatprep.subr.bf16.mxu0 %v208_v3  ;;  %v21_v10 = vld [vmem:[%s300_s0 + $0x38] sm:$0xff]  ;;  %v173_v11 = vld [vmem:[%s301_s2] ss:$0 sm:$0xff] }
   0x5   :  { %212 = vmatprep.subr.bf16.mxu1 %v208_v3  ;;  %211 = vmatpush3.bf16.msra.mxu0 %v208_v3 }
   0x6   :  { %213 = vmatpush3.bf16.msra.mxu1 %v208_v3 }
   0x8   :  { %197 = vmatmul.mubr.msk.f32.vlgmr.msra.gmra.mrb[0].mxu0 %vm31_vm0, %v15_v5 }
   0x9   :  { %203 = vmatmul.mubr.msk.f32.vlgmr.msra.gmra.mrb[0].mxu1 %vm31_vm0, %v19_v6  ;;  %199 = vmatprep.mubr.msk.f32.mxu0 %vm31_vm0, %v16_v7 }
   0xa   :  { %205 = vmatprep.mubr.msk.f32.mxu1 %vm31_vm0, %v20_v8 }
   0xc   :  { %200 = vmatmul.mubr.msk.f32.gmra.mrb[2].mxu0 %vm31_vm0, %v17_v9 }
   0xd   :  { %206 = vmatmul.mubr.msk.f32.gmra.mrb[2].mxu1 %vm31_vm0, %v21_v10 }
  0xdb   :  { %v198_v12 = vpop.f32.mrb[0].mxu0 }
  0xdc   :  { %v204_v13 = vpop.f32.mrb[0].mxu1  ;;  %v128_v14 = vadd.f32 %v198_v12, %v173_v11  ;;  %v122_v16 = vpop.f32.mrb[1].mxu0 }
  0xdd   :  { %v148_v15 = vadd.f32 %v204_v13, %v173_v11  ;;  %v142_v17 = vpop.f32.mrb[1].mxu1  ;;  %v123_v18 = vadd.f32 %v173_v11, %v122_v16 }
  0xde   :  { %v143_v19 = vadd.f32 %v173_v11, %v142_v17  ;;  %162 = vst [vmem:[%s302_s3 + $0x8] sm:$0xff] %v128_v14 }
  0xdf   :  { %166 = vst [vmem:[%s302_s3 + $0x28] sm:$0xff] %v148_v15  ;;  %161 = vst [vmem:[%s302_s3] sm:$0xff] %v123_v18  ;;  %v201_v20 = vpop.f32.mrb[2].mxu0 }
  0xe0   :  { %165 = vst [vmem:[%s302_s3 + $0x20] sm:$0xff] %v143_v19  ;;  %v207_v21 = vpop.f32.mrb[2].mxu1  ;;  %v138_v22 = vadd.f32 %v201_v20, %v173_v11  ;;  %v132_v24 = vpop.f32.mrb[3].mxu0 }
  0xe1   :  { %v158_v23 = vadd.f32 %v207_v21, %v173_v11  ;;  %v152_v25 = vpop.f32.mrb[3].mxu1  ;;  %v133_v26 = vadd.f32 %v173_v11, %v132_v24 }
  0xe2   :  { %v153_v27 = vadd.f32 %v173_v11, %v152_v25  ;;  %164 = vst [vmem:[%s302_s3 + $0x18] sm:$0xff] %v138_v22 }
  0xe3   :  { %168 = vst [vmem:[%s302_s3 + $0x38] sm:$0xff] %v158_v23  ;;  %163 = vst [vmem:[%s302_s3 + $0x10] sm:$0xff] %v133_v26 }
  0xe4   :  { %167 = vst [vmem:[%s302_s3 + $0x30] sm:$0xff] %v153_v27 }

// kernel: forward.4
= control target key start
LH: loop header
LB: loop body
LE: loop exit
PB: predicated region body
PF: predicated region fallthrough
CT: control target
= control target key end

     0   :  { %9 = vsyncpa [#allocation4], 0  ;;  %s2517_s15 = smov 0   ;;  %s2956_s0 = inlined_call_operand.vmem [shape: f32[8,8,128], index: 0, kind: input, shape index: {}]   ;;  %s2957_s1 = inlined_call_operand.hbm [shape: f32[2,128,128], index: 1, kind: input, shape index: {}]   ;;  %s2958_s2 = inlined_call_operand.vmem [shape: f32[2,128,128], index: 2, kind: input, shape index: {}]   ;;  %s2959_s3 = inlined_call_operand.vmem [shape: f32[2,1,128], index: 3, kind: input, shape index: {}]   ;;  %s2960_s4 = inlined_call_operand.vmem [shape: f32[8,8,128], index: 4, kind: output, shape index: {}]  }
   0x1 LB: > { %s2523_s16 = sadd.s32 4294967295, %s2483_s15   ;;  %p1402_p0 = scmp.ge.s32.totalorder %s2483_s15, 1  ;;  %s2483_s15 = sphi %s2517_s15, %s15_s15  }
   0x2   : > { %p135_p1 = scmp.lt.s32.totalorder %s2483_s15, 3  ;;  %s2485_s17 = smov [#allocation3]  }
   0x3   : > { %s147_s18 = sshll.u32 %s2485_s17, 4  ;;  %p2961_p4 = scmp.eq.s32.totalorder %s2523_s16, 0  ;;  %s148_s18 = int_to_ptr.vmem [resolvable:$true] %s147_s18 }
   0x4   : > { %p2528_p3 = pnand %p1402_p0, %p135_p1  ;;  %s2445_s23 = scalar_lea.hbm %s2957_s1, 4096 }
   0x5   : > { %p2446_p7 = scmp.ne.s32.totalorder %s2957_s1, %s2445_s23  ;;  %p2452_p11 = scmp.lt.u32.totalorder %s2445_s23, %s2957_s1 }
   0x6   : > { %s2963_s19 = scalar_select %p2528_p3, 1, 0 }
   0x7   : > { %p2408_p5 = pneg %p2528_p3 }
   0x9   : > { %p2537_p6 = pnand %p2961_p4, %p2408_p5 }
   0xb   : > { %p2447_p8 = pneg %p2537_p6 }
   0xd   : > { %p2448_p9 = pnand %p2447_p8, %p2446_p7 }
   0xf   : > { %p2449_p10 = pneg %p2448_p9 }
  0x11   : > { %p2454_p12 = pnand %p2452_p11, %p2449_p10 }
  0x13   : > { %2457 = shalt.err (!%p2454_p12)
}
  0x14   : > { %s2458_s28 = scalar_lea.vmem %s148_s18, 4096  ;;  %p2466_p5 = scmp.lt.s32.totalorder %s148_s18, %s148_s18 }
  0x15   : > { %p2459_p13 = scmp.ne.s32.totalorder %s148_s18, %s2458_s28  ;;  %p2467_p2 = scmp.lt.s32.totalorder %s2458_s28, %s2458_s28 }
  0x17   : > { %p2461_p0 = pnand %p2459_p13, %p2447_p8  ;;  %p2468_p4 = por %p2467_p2, %p2466_p5 }
  0x19   : > { %p2462_p1 = pneg %p2461_p0 }
  0x1b   : > { %p2469_p3 = pnand %p2468_p4, %p2462_p1 }
  0x1d   : > { %2472 = shalt.err (!%p2469_p3)
}
  0x1e   : > { %s2486_s29 = smov 128   ;;  %s2487_s30 = smov 8  }
  0x1f   : > { %2411 = dma.hbm_to_vmem [thread:$0]  (!%p2537_p6), %s2957_s1, 4096, %s148_s18, [#allocation4], %s2486_s29, %s2486_s29, %s2487_s30  }
  0x20   : > { %p2965_p7 = scmp.ne.s32.totalorder %s2963_s19, 0 }
  0x21   : > { %p2966_p9 = scmp.eq.s32.totalorder (!%p2965_p7), %s2523_s16, 0 }
  0x22   : > { %178 = sbr.rel (%p2965_p7) target bundleno = 1250 (0x4e2), region = 36 }
  0x29   : > { %2478 = dma.done.wait (%p2966_p9), [#allocation4], 4096   ;;  %p2967_p8 = pmov %p2966_p9 }
  0x2a   : > { %s1407_s7 = sshll.u32 %s2523_s16, 2  ;;  %p2968_p3 = scmp.ne.s32.totalorder %s2523_s16, 0 }
  0x2b   : > { %2480 = vsyncadd (%p2967_p8), [#allocation4], 4294963200  ;;  %p205_p2 = scmp.lt.s32.totalorder %s1407_s7, 7  ;;  %v2488_v0 = vmov (!%p2968_p3), 0.0  }
  0x2c   : > { %219 = sbr.rel (%p2968_p3) target bundleno = 51 (0x33), region = 44  ;;  %220 = vst [vmem:[#allocation2] sm:$0xff] (!%p2968_p3), %v2488_v0  ;;  %221 = vst [vmem:[#allocation2 + $0x8] sm:$0xff] (!%p2968_p3), %v2488_v0 }
  0x2d   : > { %s2970_s7 = smov (!%p205_p2, %s1407_s7), 7 }
  0x2e   : > { %s1408_s8 = sshll.u32 %s2970_s7, 3 }
  0x2f   : > { %s2567_s11 = scalar_lea.vmem %s2956_s0, %s1408_s8  ;;  %s2572_s14 = scalar_lea.vmem %s2960_s4, %s1408_s8 }
  0x33 PF: > { %v224_v1 = vld [vmem:[%s2958_s2] sm:$0xff]  ;;  %v225_v2 = vld [vmem:[%s2958_s2 + $0x8] sm:$0xff]  ;;  %v226_v3 = vld [vmem:[%s2958_s2 + $0x10] sm:$0xff]  ;;  %v2489_v4 = vmov 0.0|0.0   ;;  %vm2490_vm0 = vmmov 0   ;;  %v2491_v7 = vmov 0.0  }
  0x34   : > { %2116 = vmatprep.subr.bf16.mxu0 %v2489_v4  ;;  %v2586_v5 = vpack.c.bf16 %v225_v2, %v224_v1  ;;  %v227_v6 = vld [vmem:[%s2958_s2 + $0x18] sm:$0xff]  ;;  %1728 = vmatprep.mubr.msk.f32.mxu0 %vm2490_vm0, %v2491_v7  ;;  %v228_v9 = vld [vmem:[%s2958_s2 + $0x20] sm:$0xff]  ;;  %v229_v10 = vld [vmem:[%s2958_s2 + $0x28] sm:$0xff] }
  0x35   : > { %2140 = vmatprep.subr.bf16.mxu1 %v2489_v4  ;;  %1763 = vmatprep.mubr.msk.f32.mxu1 %vm2490_vm0, %v2491_v7  ;;  %v2597_v8 = vpack.c.bf16 %v227_v6, %v226_v3  ;;  %v1412_v11 = vld [vmem:[%s2958_s2 + $0x80] sm:$0xff]  ;;  %v1413_v12 = vld [vmem:[%s2958_s2 + $0x88] sm:$0xff]  ;;  %v1414_v13 = vld [vmem:[%s2958_s2 + $0x90] sm:$0xff]  ;;  %v2619_v15 = vpack.c.bf16 %v229_v10, %v228_v9 }
  0x36   : > { %2118 = vmatpush3.bf16.msra.mxu0 %v2586_v5  ;;  %v1415_v14 = vld [vmem:[%s2958_s2 + $0x98] sm:$0xff]  ;;  %v2621_v16 = vpack.c.bf16 %v1413_v12, %v1412_v11  ;;  %v230_v17 = vld [vmem:[%s2958_s2 + $0x30] sm:$0xff]  ;;  %v1416_v20 = vld [vmem:[%s2958_s2 + $0xa0] sm:$0xff] }
  0x37   : > { %2119 = vmatprep.subr.bf16.mxu0 %v2489_v4  ;;  %v231_v18 = vld [vmem:[%s2958_s2 + $0x38] sm:$0xff]  ;;  %v2631_v19 = vpack.c.bf16 %v1415_v14, %v1414_v13  ;;  %v1417_v21 = vld [vmem:[%s2958_s2 + $0xa8] sm:$0xff]  ;;  %v232_v23 = vld [vmem:[%s2958_s2 + $0x40] sm:$0xff] }
  0x38   : > { %2142 = vmatpush3.bf16.msra.mxu1 %v2621_v16  ;;  %v2641_v22 = vpack.c.bf16 %v231_v18, %v230_v17  ;;  %v233_v24 = vld [vmem:[%s2958_s2 + $0x48] sm:$0xff]  ;;  %v2651_v25 = vpack.c.bf16 %v1417_v21, %v1416_v20  ;;  %v1418_v26 = vld [vmem:[%s2958_s2 + $0xb0] sm:$0xff]  ;;  %v1419_v27 = vld [vmem:[%s2958_s2 + $0xb8] sm:$0xff] }
  0x39   : > { %2143 = vmatprep.subr.bf16.mxu1 %v2489_v4  ;;  %v2661_v28 = vpack.c.bf16 %v233_v24, %v232_v23  ;;  %v234_v29 = vld [vmem:[%s2958_s2 + $0x50] sm:$0xff]  ;;  %v235_v30 = vld [vmem:[%s2958_s2 + $0x58] sm:$0xff]  ;;  %v2671_v31 = vpack.c.bf16 %v1419_v27, %v1418_v26  ;;  %v1420_v32 = vld [vmem:[%s2958_s2 + $0xc0] sm:$0xff] }
  0x3a   : > { %2121 = vmatpush3.bf16.msra.mxu0 %v2597_v8  ;;  %v1421_v33 = vld [vmem:[%s2958_s2 + $0xc8] sm:$0xff]  ;;  %v2681_v34 = vpack.c.bf16 %v235_v30, %v234_v29  ;;  %v236_v35 = vld [vmem:[%s2958_s2 + $0x60] sm:$0xff]  ;;  %v1422_v38 = vld [vmem:[%s2958_s2 + $0xd0] sm:$0xff] }
  0x3b   : > { %2122 = vmatprep.subr.bf16.mxu0 %v2489_v4  ;;  %v237_v36 = vld [vmem:[%s2958_s2 + $0x68] sm:$0xff]  ;;  %v2691_v37 = vpack.c.bf16 %v1421_v33, %v1420_v32  ;;  %v1423_v39 = vld [vmem:[%s2958_s2 + $0xd8] sm:$0xff]  ;;  %v238_v41 = vld [vmem:[%s2958_s2 + $0x70] sm:$0xff] }
  0x3c   : > { %2145 = vmatpush3.bf16.msra.mxu1 %v2631_v19  ;;  %v2701_v40 = vpack.c.bf16 %v237_v36, %v236_v35  ;;  %v239_v42 = vld [vmem:[%s2958_s2 + $0x78] sm:$0xff]  ;;  %v2711_v43 = vpack.c.bf16 %v1423_v39, %v1422_v38  ;;  %v1424_v44 = vld [vmem:[%s2958_s2 + $0xe0] sm:$0xff]  ;;  %v1425_v45 = vld [vmem:[%s2958_s2 + $0xe8] sm:$0xff] }
  0x3d   : > { %2146 = vmatprep.subr.bf16.mxu1 %v2489_v4  ;;  %v2721_v46 = vpack.c.bf16 %v239_v42, %v238_v41  ;;  %v314_v47 = vld [vmem:[#allocation3 + $0x80] sm:$0xff]  ;;  %v315_v48 = vld [vmem:[#allocation3 + $0x88] sm:$0xff]  ;;  %v2725_v49 = vpack.c.bf16 %v1425_v45, %v1424_v44  ;;  %v223_v52 = vld [vmem:[#allocation2] sm:$0xff] }
  0x3e   : > { %2124 = vmatpush3.bf16.msra.mxu0 %v2619_v15  ;;  %v1426_v50 = vld [vmem:[%s2958_s2 + $0xf0] sm:$0xff]  ;;  %v1427_v51 = vld [vmem:[%s2958_s2 + $0xf8] sm:$0xff]  ;;  %v2735_v53 = vpack.c.bf16 %v315_v48, %v314_v47  ;;  %v316_v54 = vld [vmem:[#allocation3 + $0x90] sm:$0xff] }
  0x3f   : > { %2125 = vmatprep.subr.bf16.mxu0 %v2489_v4  ;;  %v317_v55 = vld [vmem:[#allocation3 + $0x98] sm:$0xff]  ;;  %v2739_v56 = vpack.c.bf16 %v1427_v51, %v1426_v50  ;;  %v318_v58 = vld [vmem:[#allocation3 + $0xa0] sm:$0xff]  ;;  %v319_v59 = vld [vmem:[#allocation3 + $0xa8] sm:$0xff] }
  0x40   : > { %2148 = vmatpush3.bf16.msra.mxu1 %v2651_v25  ;;  %v2743_v57 = vpack.c.bf16 %v317_v55, %v316_v54  ;;  %v331_v60 = vld [vmem:[#allocation2 + $0x8] sm:$0xff]  ;;  %v2751_v61 = vpack.c.bf16 %v319_v59, %v318_v58  ;;  %v320_v62 = vld [vmem:[#allocation3 + $0xb0] sm:$0xff]  ;;  %v322_v1 = vld [vmem:[#allocation3 + $0xc0] sm:$0xff] }
  0x41   : > { %2149 = vmatprep.subr.bf16.mxu1 %v2489_v4  ;;  %v321_v63 = vld [vmem:[#allocation3 + $0xb8] sm:$0xff]  ;;  %v323_v2 = vld [vmem:[#allocation3 + $0xc8] sm:$0xff]  ;;  %v324_v6 = vld [vmem:[#allocation3 + $0xd0] sm:$0xff] }
  0x42   : > { %2127 = vmatpush3.bf16.msra.mxu0 %v2641_v22  ;;  %v2759_v0 = vpack.c.bf16 %v321_v63, %v320_v62  ;;  %v2765_v3 = vpack.c.bf16 %v323_v2, %v322_v1  ;;  %v325_v9 = vld [vmem:[#allocation3 + $0xd8] sm:$0xff]  ;;  %v326_v11 = vld [vmem:[#allocation3 + $0xe0] sm:$0xff]  ;;  %v327_v12 = vld [vmem:[#allocation3 + $0xe8] sm:$0xff] }
  0x43   : > { %2128 = vmatprep.subr.bf16.mxu0 %v2489_v4  ;;  %v2782_v10 = vpack.c.bf16 %v325_v9, %v324_v6  ;;  %v2786_v13 = vpack.c.bf16 %v327_v12, %v326_v11  ;;  %v328_v14 = vld [vmem:[#allocation3 + $0xf0] sm:$0xff]  ;;  %v329_v17 = vld [vmem:[#allocation3 + $0xf8] sm:$0xff]  ;;  %v1450_v58 = vld [vmem:[%s2567_s11 + $0x10] sm:$0xff] }
  0x44   : > { %2151 = vmatpush3.bf16.msra.mxu1 %v2671_v31  ;;  %v2789_v18 = vpack.c.bf16 %v329_v17, %v328_v14  ;;  %v222_v20 = vld [vmem:[%s2567_s11] sm:$0xff]  ;;  %v1430_v30 = vld [vmem:[%s2567_s11 + $0x8] sm:$0xff] }
  0x45   : > { %2152 = vmatprep.subr.bf16.mxu1 %v2489_v4  ;;  %v2835_v33 = vld [vmem:[%s2959_s3 + $0x1] ss:$0 sm:$0xff] }
  0x46   : > { %2130 = vmatpush3.bf16.msra.mxu0 %v2661_v28 }
  0x47   : > { %2131 = vmatprep.subr.bf16.mxu0 %v2489_v4 }
  0x48   : > { %2154 = vmatpush3.bf16.msra.mxu1 %v2691_v37 }
  0x49   : > { %2155 = vmatprep.subr.bf16.mxu1 %v2489_v4 }
  0x4a   : > { %2133 = vmatpush3.bf16.msra.mxu0 %v2681_v34 }
  0x4b   : > { %2134 = vmatprep.subr.bf16.mxu0 %v2489_v4 }
  0x4c   : > { %2157 = vmatpush3.bf16.msra.mxu1 %v2711_v43 }
  0x4d   : > { %2158 = vmatprep.subr.bf16.mxu1 %v2489_v4 }
  0x4e   : > { %2136 = vmatpush3.bf16.msra.mxu0 %v2701_v40 }
  0x4f   : > { %2137 = vmatprep.subr.bf16.mxu0 %v2489_v4 }
  0x50   : > { %2160 = vmatpush3.bf16.msra.mxu1 %v2725_v49 }
  0x51   : > { %2161 = vmatprep.subr.bf16.mxu1 %v2489_v4 }
  0x52   : > { %2139 = vmatpush3.bf16.msra.mxu0 %v2721_v46 }
  0x53   : > { %2164 = vmatprep.subr.bf16.mxu0 %v2489_v4 }
  0x54   : > { %2163 = vmatpush3.bf16.msra.mxu1 %v2739_v56 }
  0x55   : > { %1729 = vmatmul.mubr.f32.vlgmr.msra.gmra.mrb[0].mxu0 %v223_v52  ;;  %2188 = vmatprep.subr.bf16.mxu1 %v2489_v4 }
  0x56   : > { %2166 = vmatpush3.bf16.msra.mxu0 %v2735_v53  ;;  %1798 = vmatprep.mubr.msk.f32.mxu0 %vm2490_vm0, %v2491_v7 }
  0x57   : > { %2167 = vmatprep.subr.bf16.mxu0 %v2489_v4  ;;  %1764 = vmatmul.mubr.f32.vlgmr.msra.gmra.mrb[0].mxu1 %v331_v60 }
  0x58   : > { %2190 = vmatpush3.bf16.msra.mxu1 %v2586_v5  ;;  %1833 = vmatprep.mubr.msk.f32.mxu1 %vm2490_vm0, %v2491_v7 }
  0x59   : > { %2191 = vmatprep.subr.bf16.mxu1 %v2489_v4 }
  0x5a   : > { %2169 = vmatpush3.bf16.msra.mxu0 %v2743_v57 }
  0x5b   : > { %2170 = vmatprep.subr.bf16.mxu0 %v2489_v4 }
  0x5c   : > { %2193 = vmatpush3.bf16.msra.mxu1 %v2597_v8 }
  0x5d   : > { %2194 = vmatprep.subr.bf16.mxu1 %v2489_v4 }
  0x5e   : > { %2172 = vmatpush3.bf16.msra.mxu0 %v2751_v61 }
  0x5f   : > { %2173 = vmatprep.subr.bf16.mxu0 %v2489_v4 }
  0x60   : > { %2196 = vmatpush3.bf16.msra.mxu1 %v2619_v15 }
  0x61   : > { %2197 = vmatprep.subr.bf16.mxu1 %v2489_v4 }
  0x62   : > { %2175 = vmatpush3.bf16.msra.mxu0 %v2759_v0 }
  0x63   : > { %2176 = vmatprep.subr.bf16.mxu0 %v2489_v4 }
  0x64   : > { %2199 = vmatpush3.bf16.msra.mxu1 %v2641_v22 }
  0x65   : > { %2200 = vmatprep.subr.bf16.mxu1 %v2489_v4 }
  0x66   : > { %2178 = vmatpush3.bf16.msra.mxu0 %v2765_v3 }
  0x67   : > { %2179 = vmatprep.subr.bf16.mxu0 %v2489_v4 }
  0x68   : > { %2202 = vmatpush3.bf16.msra.mxu1 %v2661_v28 }
  0x69   : > { %2203 = vmatprep.subr.bf16.mxu1 %v2489_v4 }
  0x6a   : > { %2181 = vmatpush3.bf16.msra.mxu0 %v2782_v10 }
  0x6b   : > { %2182 = vmatprep.subr.bf16.mxu0 %v2489_v4 }
  0x6c   : > { %2205 = vmatpush3.bf16.msra.mxu1 %v2681_v34 }
  0x6d   : > { %2206 = vmatprep.subr.bf16.mxu1 %v2489_v4 }
  0x6e   : > { %2184 = vmatpush3.bf16.msra.mxu0 %v2786_v13 }
  0x6f   : > { %2185 = vmatprep.subr.bf16.mxu0 %v2489_v4 }
  0x70   : > { %2208 = vmatpush3.bf16.msra.mxu1 %v2701_v40 }
  0x71   : > { %2209 = vmatprep.subr.bf16.mxu1 %v2489_v4 }
  0x72   : > { %2187 = vmatpush3.bf16.msra.mxu0 %v2789_v18 }
  0x73   : > { %2212 = vmatprep.subr.bf16.mxu0 %v2489_v4 }
  0x74   : > { %2211 = vmatpush3.bf16.msra.mxu1 %v2721_v46 }
  0x75   : > { %2236 = vmatprep.subr.bf16.mxu1 %v2489_v4 }
 0x128   : > { %v306_v21 = vpop.f32.mrb[0].mxu0 }
 0x129   : > { %v310_v23 = vadd.f32 %v306_v21, %v222_v20  ;;  %v1730_v24 = vpop.f32.mrb[1].mxu0 }
 0x12a   : > { %v415_v26 = vpop.f32.mrb[0].mxu1 }
 0x12b   : > { %2429 = vtanh.f32 %v310_v23  ;;  %v1765_v27 = vpop.f32.mrb[1].mxu1 }
 0x135   : > { %v2430_v29 = vpop.eup %2429 }
 0x136   : > { %1799 = vmatmul.mubr.f32.vlgmr.msra.gmra.mrb[2].mxu0 %v2430_v29  ;;  %1834 = vmatmul.mubr.f32.vlgmr.msra.gmra.mrb[2].mxu1 %v2430_v29 }
 0x137   : > { %2238 = vmatpush3.bf16.msra.mxu1 %v2735_v53  ;;  %2214 = vmatpush3.bf16.msra.mxu0 %v2621_v16 }
 0x138   : > { %2239 = vmatprep.subr.bf16.mxu1 %v2489_v4  ;;  %2215 = vmatprep.subr.bf16.mxu0 %v2489_v4 }
 0x139   : > { %1903 = vmatprep.mubr.msk.f32.mxu1 %vm2490_vm0, %v2491_v7  ;;  %1868 = vmatprep.mubr.msk.f32.mxu0 %vm2490_vm0, %v2491_v7 }
 0x13b   : > { %2241 = vmatpush3.bf16.msra.mxu1 %v2743_v57  ;;  %2217 = vmatpush3.bf16.msra.mxu0 %v2631_v19 }
 0x13c   : > { %2242 = vmatprep.subr.bf16.mxu1 %v2489_v4  ;;  %2218 = vmatprep.subr.bf16.mxu0 %v2489_v4 }
 0x13f   : > { %2244 = vmatpush3.bf16.msra.mxu1 %v2751_v61  ;;  %2220 = vmatpush3.bf16.msra.mxu0 %v2651_v25 }
 0x140   : > { %2245 = vmatprep.subr.bf16.mxu1 %v2489_v4  ;;  %2221 = vmatprep.subr.bf16.mxu0 %v2489_v4 }
 0x143   : > { %2247 = vmatpush3.bf16.msra.mxu1 %v2759_v0  ;;  %2223 = vmatpush3.bf16.msra.mxu0 %v2671_v31 }
 0x144   : > { %2248 = vmatprep.subr.bf16.mxu1 %v2489_v4  ;;  %2224 = vmatprep.subr.bf16.mxu0 %v2489_v4 }
 0x147   : > { %2250 = vmatpush3.bf16.msra.mxu1 %v2765_v3  ;;  %2226 = vmatpush3.bf16.msra.mxu0 %v2691_v37 }
 0x148   : > { %2251 = vmatprep.subr.bf16.mxu1 %v2489_v4  ;;  %2227 = vmatprep.subr.bf16.mxu0 %v2489_v4 }
 0x14b   : > { %2253 = vmatpush3.bf16.msra.mxu1 %v2782_v10  ;;  %2229 = vmatpush3.bf16.msra.mxu0 %v2711_v43 }
 0x14c   : > { %2254 = vmatprep.subr.bf16.mxu1 %v2489_v4  ;;  %2230 = vmatprep.subr.bf16.mxu0 %v2489_v4 }
 0x14f   : > { %2256 = vmatpush3.bf16.msra.mxu1 %v2786_v13  ;;  %2232 = vmatpush3.bf16.msra.mxu0 %v2725_v49 }
 0x150   : > { %2257 = vmatprep.subr.bf16.mxu1 %v2489_v4  ;;  %2233 = vmatprep.subr.bf16.mxu0 %v2489_v4 }
 0x153   : > { %2259 = vmatpush3.bf16.msra.mxu1 %v2789_v18  ;;  %2235 = vmatpush3.bf16.msra.mxu0 %v2739_v56 }
 0x154   : > { %2260 = vmatprep.subr.bf16.mxu0 %v2489_v4  ;;  %2284 = vmatprep.subr.bf16.mxu1 %v2489_v4 }
 0x209   : > { %v485_v32 = vpop.f32.mrb[2].mxu0  ;;  %v586_v35 = vpop.f32.mrb[2].mxu1 }
 0x20a   : > { %v486_v36 = vadd.f32 %v485_v32, %v415_v26  ;;  %v1800_v38 = vpop.f32.mrb[3].mxu0  ;;  %v590_v39 = vadd.f32 %v1430_v30, %v586_v35  ;;  %v1835_v41 = vpop.f32.mrb[3].mxu1 }
 0x20c   : > { %v497_v42 = vadd.f32 %v2835_v33, %v486_v36  ;;  %2431 = vtanh.f32 %v590_v39 }
 0x20e   : > { %2433 = vtanh.f32 %v497_v42 }
 0x216   : > { %v2432_v44 = vpop.eup %2431 }
 0x217   : > { %1904 = vmatmul.mubr.f32.vlgmr.msra.gmra.mrb[4].mxu1 %v2432_v44 }
 0x218   : > { %v2434_v45 = vpop.eup %2433  ;;  %2286 = vmatpush3.bf16.msra.mxu1 %v2621_v16  ;;  %1973 = vmatprep.mubr.msk.f32.mxu1 %vm2490_vm0, %v2491_v7 }
 0x219   : > { %500 = vst [vmem:[%s2572_s14] sm:$0xff] %v2434_v45  ;;  %1869 = vmatmul.mubr.f32.vlgmr.msra.gmra.mrb[4].mxu0 %v2434_v45  ;;  %2287 = vmatprep.subr.bf16.mxu1 %v2489_v4 }
 0x21a   : > { %2262 = vmatpush3.bf16.msra.mxu0 %v2586_v5  ;;  %1938 = vmatprep.mubr.msk.f32.mxu0 %vm2490_vm0, %v2491_v7 }
 0x21b   : > { %2263 = vmatprep.subr.bf16.mxu0 %v2489_v4 }
 0x21c   : > { %2289 = vmatpush3.bf16.msra.mxu1 %v2631_v19 }
 0x21d   : > { %2290 = vmatprep.subr.bf16.mxu1 %v2489_v4 }
 0x21e   : > { %2265 = vmatpush3.bf16.msra.mxu0 %v2597_v8 }
 0x21f   : > { %2266 = vmatprep.subr.bf16.mxu0 %v2489_v4 }
 0x220   : > { %2292 = vmatpush3.bf16.msra.mxu1 %v2651_v25 }
 0x221   : > { %2293 = vmatprep.subr.bf16.mxu1 %v2489_v4 }
 0x222   : > { %2268 = vmatpush3.bf16.msra.mxu0 %v2619_v15 }
 0x223   : > { %2269 = vmatprep.subr.bf16.mxu0 %v2489_v4 }
 0x224   : > { %2295 = vmatpush3.bf16.msra.mxu1 %v2671_v31 }
 0x225   : > { %2296 = vmatprep.subr.bf16.mxu1 %v2489_v4 }
 0x226   : > { %2271 = vmatpush3.bf16.msra.mxu0 %v2641_v22 }
 0x227   : > { %2272 = vmatprep.subr.bf16.mxu0 %v2489_v4 }
 0x228   : > { %2298 = vmatpush3.bf16.msra.mxu1 %v2691_v37 }
 0x229   : > { %2299 = vmatprep.subr.bf16.mxu1 %v2489_v4 }
 0x22a   : > { %2274 = vmatpush3.bf16.msra.mxu0 %v2661_v28 }
 0x22b   : > { %2275 = vmatprep.subr.bf16.mxu0 %v2489_v4 }
 0x22c   : > { %2301 = vmatpush3.bf16.msra.mxu1 %v2711_v43 }
 0x22d   : > { %2302 = vmatprep.subr.bf16.mxu1 %v2489_v4 }
 0x22e   : > { %2277 = vmatpush3.bf16.msra.mxu0 %v2681_v34 }
 0x22f   : > { %2278 = vmatprep.subr.bf16.mxu0 %v2489_v4 }
 0x230   : > { %2304 = vmatpush3.bf16.msra.mxu1 %v2725_v49 }
 0x231   : > { %2305 = vmatprep.subr.bf16.mxu1 %v2489_v4 }
 0x232   : > { %2280 = vmatpush3.bf16.msra.mxu0 %v2701_v40 }
 0x233   : > { %2281 = vmatprep.subr.bf16.mxu0 %v2489_v4 }
 0x234   : > { %2307 = vmatpush3.bf16.msra.mxu1 %v2739_v56 }
 0x235   : > { %2332 = vmatprep.subr.bf16.mxu1 %v2489_v4 }
 0x236   : > { %2283 = vmatpush3.bf16.msra.mxu0 %v2721_v46 }
 0x237   : > { %2308 = vmatprep.subr.bf16.mxu0 %v2489_v4 }
 0x239   : > { %1939 = vmatmul.mubr.f32.vlgmr.msra.gmra.mrb[6].mxu0 %v2432_v44 }
 0x23a   : > { %2310 = vmatpush3.bf16.msra.mxu0 %v2735_v53  ;;  %2008 = vmatprep.mubr.msk.f32.mxu0 %vm2490_vm0, %v2491_v7 }
 0x23b   : > { %2311 = vmatprep.subr.bf16.mxu0 %v2489_v4 }
 0x23e   : > { %2313 = vmatpush3.bf16.msra.mxu0 %v2743_v57 }
 0x23f   : > { %2314 = vmatprep.subr.bf16.mxu0 %v2489_v4 }
 0x242   : > { %2316 = vmatpush3.bf16.msra.mxu0 %v2751_v61 }
 0x243   : > { %2317 = vmatprep.subr.bf16.mxu0 %v2489_v4 }
 0x246   : > { %2319 = vmatpush3.bf16.msra.mxu0 %v2759_v0 }
 0x247   : > { %2320 = vmatprep.subr.bf16.mxu0 %v2489_v4 }
 0x24a   : > { %2322 = vmatpush3.bf16.msra.mxu0 %v2765_v3 }
 0x24b   : > { %2323 = vmatprep.subr.bf16.mxu0 %v2489_v4 }
 0x24e   : > { %2325 = vmatpush3.bf16.msra.mxu0 %v2782_v10 }
 0x24f   : > { %2326 = vmatprep.subr.bf16.mxu0 %v2489_v4 }
 0x252   : > { %2328 = vmatpush3.bf16.msra.mxu0 %v2786_v13 }
 0x253   : > { %2329 = vmatprep.subr.bf16.mxu0 %v2489_v4 }
 0x256   : > { %2331 = vmatpush3.bf16.msra.mxu0 %v2789_v18 }
 0x257   : > { %2356 = vmatprep.subr.bf16.mxu0 %v2489_v4 }
 0x2ea   : > { %v762_v47 = vpop.f32.mrb[4].mxu1 }
 0x2eb   : > { %v1905_v48 = vpop.f32.mrb[5].mxu1 }
 0x2ec   : > { %v692_v50 = vpop.f32.mrb[4].mxu0 }
 0x2ed   : > { %v763_v51 = vadd.f32 %v762_v47, %v692_v50  ;;  %v1870_v52 = vpop.f32.mrb[5].mxu0 }
 0x2ef   : > { %v773_v54 = vadd.f32 %v2835_v33, %v763_v51 }
 0x2f1   : > { %2435 = vtanh.f32 %v773_v54 }
 0x2fb   : > { %v2436_v55 = vpop.eup %2435 }
 0x2fc   : > { %1449 = vst [vmem:[%s2572_s14 + $0x8] sm:$0xff] %v2436_v55  ;;  %1974 = vmatmul.mubr.f32.vlgmr.msra.gmra.mrb[6].mxu1 %v2436_v55 }
 0x2fd   : > { %2334 = vmatpush3.bf16.msra.mxu1 %v2586_v5  ;;  %2043 = vmatprep.mubr.msk.f32.mxu1 %vm2490_vm0, %v2491_v7 }
 0x2fe   : > { %2335 = vmatprep.subr.bf16.mxu1 %v2489_v4 }
 0x301   : > { %2337 = vmatpush3.bf16.msra.mxu1 %v2597_v8 }
 0x302   : > { %2338 = vmatprep.subr.bf16.mxu1 %v2489_v4 }
 0x305   : > { %2340 = vmatpush3.bf16.msra.mxu1 %v2619_v15 }
 0x306   : > { %2341 = vmatprep.subr.bf16.mxu1 %v2489_v4 }
 0x309   : > { %2343 = vmatpush3.bf16.msra.mxu1 %v2641_v22 }
 0x30a   : > { %2344 = vmatprep.subr.bf16.mxu1 %v2489_v4 }
 0x30c   : > { %v863_v59 = vpop.f32.mrb[6].mxu0 }
 0x30d   : > { %v867_v5 = vadd.f32 %v1450_v58, %v863_v59  ;;  %v1940_v60 = vpop.f32.mrb[7].mxu0  ;;  %2346 = vmatpush3.bf16.msra.mxu1 %v2661_v28 }
 0x30e   : > { %2347 = vmatprep.subr.bf16.mxu1 %v2489_v4 }
 0x30f   : > { %2437 = vtanh.f32 %v867_v5 }
 0x311   : > { %2349 = vmatpush3.bf16.msra.mxu1 %v2681_v34 }
 0x312   : > { %2350 = vmatprep.subr.bf16.mxu1 %v2489_v4 }
 0x315   : > { %2352 = vmatpush3.bf16.msra.mxu1 %v2701_v40 }
 0x316   : > { %2353 = vmatprep.subr.bf16.mxu1 %v2489_v4 }
 0x319   : > { %v2438_v8 = vpop.eup %2437  ;;  %2355 = vmatpush3.bf16.msra.mxu1 %v2721_v46 }
 0x31a   : > { %2009 = vmatmul.mubr.f32.vlgmr.msra.gmra.mrb[8].mxu0 %v2438_v8  ;;  %2380 = vmatprep.subr.bf16.mxu1 %v2489_v4 }
 0x31b   : > { %2358 = vmatpush3.bf16.msra.mxu0 %v2621_v16  ;;  %2078 = vmatprep.mubr.msk.f32.mxu0 %vm2490_vm0, %v2491_v7 }
 0x31c   : > { %2044 = vmatmul.mubr.f32.vlgmr.msra.gmra.mrb[8].mxu1 %v2438_v8  ;;  %2359 = vmatprep.subr.bf16.mxu0 %v2489_v4 }
 0x31d   : > { %2382 = vmatpush3.bf16.msra.mxu1 %v2735_v53  ;;  %2113 = vmatprep.mubr.msk.f32.mxu1 %vm2490_vm0, %v2491_v7 }
 0x31e   : > { %2383 = vmatprep.subr.bf16.mxu1 %v2489_v4 }
 0x31f   : > { %2361 = vmatpush3.bf16.msra.mxu0 %v2631_v19  ;;  %v1470_v19 = vld [vmem:[%s2567_s11 + $0x18] sm:$0xff] }
 0x320   : > { %2362 = vmatprep.subr.bf16.mxu0 %v2489_v4 }
 0x321   : > { %2385 = vmatpush3.bf16.msra.mxu1 %v2743_v57 }
 0x322   : > { %2386 = vmatprep.subr.bf16.mxu1 %v2489_v4 }
 0x323   : > { %2364 = vmatpush3.bf16.msra.mxu0 %v2651_v25 }
 0x324   : > { %2365 = vmatprep.subr.bf16.mxu0 %v2489_v4 }
 0x325   : > { %2388 = vmatpush3.bf16.msra.mxu1 %v2751_v61 }
 0x326   : > { %2389 = vmatprep.subr.bf16.mxu1 %v2489_v4 }
 0x327   : > { %2367 = vmatpush3.bf16.msra.mxu0 %v2671_v31 }
 0x328   : > { %2368 = vmatprep.subr.bf16.mxu0 %v2489_v4 }
 0x329   : > { %2391 = vmatpush3.bf16.msra.mxu1 %v2759_v0 }
 0x32a   : > { %2392 = vmatprep.subr.bf16.mxu1 %v2489_v4 }
 0x32b   : > { %2370 = vmatpush3.bf16.msra.mxu0 %v2691_v37 }
 0x32c   : > { %2371 = vmatprep.subr.bf16.mxu0 %v2489_v4 }
 0x32d   : > { %2394 = vmatpush3.bf16.msra.mxu1 %v2765_v3 }
 0x32e   : > { %2395 = vmatprep.subr.bf16.mxu1 %v2489_v4 }
 0x32f   : > { %2373 = vmatpush3.bf16.msra.mxu0 %v2711_v43 }
 0x330   : > { %2374 = vmatprep.subr.bf16.mxu0 %v2489_v4 }
 0x331   : > { %2397 = vmatpush3.bf16.msra.mxu1 %v2782_v10 }
 0x332   : > { %2398 = vmatprep.subr.bf16.mxu1 %v2489_v4 }
 0x333   : > { %2376 = vmatpush3.bf16.msra.mxu0 %v2725_v49 }
 0x334   : > { %2377 = vmatprep.subr.bf16.mxu0 %v2489_v4 }
 0x335   : > { %2400 = vmatpush3.bf16.msra.mxu1 %v2786_v13 }
 0x336   : > { %2401 = vmatprep.subr.bf16.mxu1 %v2489_v4 }
 0x337   : > { %2379 = vmatpush3.bf16.msra.mxu0 %v2739_v56 }
 0x339   : > { %2403 = vmatpush3.bf16.msra.mxu1 %v2789_v18 }
 0x3cf   : > { %v969_v7 = vpop.f32.mrb[6].mxu1 }
 0x3d0   : > { %v1975_v15 = vpop.f32.mrb[7].mxu1 }
 0x3ed   : > { %v1039_v16 = vpop.f32.mrb[8].mxu0 }
 0x3ee   : > { %v1040_v22 = vadd.f32 %v1039_v16, %v969_v7  ;;  %v2010_v25 = vpop.f32.mrb[9].mxu0 }
 0x3ef   : > { %v1140_v28 = vpop.f32.mrb[8].mxu1 }
 0x3f0   : > { %v1050_v31 = vadd.f32 %v2835_v33, %v1040_v22  ;;  %v1144_v34 = vadd.f32 %v1470_v19, %v1140_v28  ;;  %v2045_v37 = vpop.f32.mrb[9].mxu1 }
 0x3f2   : > { %2439 = vtanh.f32 %v1050_v31 }
 0x3f3   : > { %2441 = vtanh.f32 %v1144_v34 }
 0x3fc   : > { %v2440_v4 = vpop.eup %2439 }
 0x3fd   : > { %v2442_v40 = vpop.eup %2441  ;;  %1469 = vst [vmem:[%s2572_s14 + $0x10] sm:$0xff] %v2440_v4  ;;  %2079 = vmatmul.mubr.f32.vlgmr.msra.gmra.mrb[10].mxu0 %v2440_v4 }
 0x3fe   : > { %1146 = vst [vmem:[#allocation2] sm:$0xff] %v2442_v40  ;;  %2114 = vmatmul.mubr.f32.vlgmr.msra.gmra.mrb[10].mxu1 %v2442_v40 }
 0x4d0   : > { %v1246_v43 = vpop.f32.mrb[10].mxu0 }
 0x4d1   : > { %v1316_v46 = vpop.f32.mrb[10].mxu1  ;;  %v2080_v49 = vpop.f32.mrb[11].mxu0 }
 0x4d2   : > { %v1317_v53 = vadd.f32 %v1316_v46, %v1246_v43  ;;  %v2115_v56 = vpop.f32.mrb[11].mxu1 }
 0x4d4   : > { %v1327_v57 = vadd.f32 %v2835_v33, %v1317_v53 }
 0x4d6   : > { %2443 = vtanh.f32 %v1327_v57 }
 0x4e0   : > { %v2444_v61 = vpop.eup %2443 }
 0x4e1   : > { %1329 = vst [vmem:[#allocation2 + $0x8] sm:$0xff] %v2444_v61  ;;  %1489 = vst [vmem:[%s2572_s14 + $0x18] sm:$0xff] %v2444_v61 }
 0x4e2 PF: > { %s15_s15 = sadd.s32 1, %s2483_s15  }
 0x4e3   : > { %p12_p4 = scmp.ge.s32.totalorder %s15_s15, 4  }
 0x4e5   :  { %14 = sbr.rel (!%p12_p4) target bundleno = 1 (0x1), region = 85 }
 0x4ec   :  { %1354 = vsyncpa [#allocation4], 1 }
 0x4ed   :  { %1356 = vsyncpa [#allocation4 + $0x1], 1 }

// kernel: forward.5
= control target key start
LH: loop header
LB: loop body
LE: loop exit
PB: predicated region body
PF: predicated region fallthrough
CT: control target
= control target key end

     0   :  { %s398_s1 = inlined_call_operand.vmem [shape: f32[128,128], index: 1, kind: input, shape index: {}]   ;;  %s399_s0 = inlined_call_operand.vmem [shape: f32[64,128], index: 0, kind: input, shape index: {}]   ;;  %s400_s2 = inlined_call_operand.vmem [shape: f32[1,128], index: 2, kind: input, shape index: {}]   ;;  %s401_s3 = inlined_call_operand.vmem [shape: f32[64,128], index: 3, kind: output, shape index: {}]  }
   0x1   :  { %v22_v0 = vld [vmem:[%s398_s1] sm:$0xff]  ;;  %v23_v1 = vld [vmem:[%s398_s1 + $0x8] sm:$0xff]  ;;  %v24_v2 = vld [vmem:[%s398_s1 + $0x10] sm:$0xff] }
   0x2   :  { %v231_v3 = vpack.c.bf16 %v23_v1, %v22_v0  ;;  %v25_v4 = vld [vmem:[%s398_s1 + $0x18] sm:$0xff]  ;;  %v26_v6 = vld [vmem:[%s398_s1 + $0x20] sm:$0xff]  ;;  %v27_v7 = vld [vmem:[%s398_s1 + $0x28] sm:$0xff] }
   0x3   :  { %v235_v5 = vpack.c.bf16 %v25_v4, %v24_v2  ;;  %v239_v8 = vpack.c.bf16 %v27_v7, %v26_v6  ;;  %v14_v9 = vld [vmem:[%s399_s0] sm:$0xff]  ;;  %v28_v11 = vld [vmem:[%s398_s1 + $0x30] sm:$0xff]  ;;  %v29_v12 = vld [vmem:[%s398_s1 + $0x38] sm:$0xff] }
   0x4   :  { %232 = vmatprep.subr.bf16.mxu0 %v231_v3  ;;  %263 = vmatprep.subr.bf16.mxu1 %v231_v3  ;;  %v18_v10 = vld [vmem:[%s399_s0 + $0x20] sm:$0xff]  ;;  %v243_v13 = vpack.c.bf16 %v29_v12, %v28_v11  ;;  %v31_v15 = vld [vmem:[%s398_s1 + $0x48] sm:$0xff]  ;;  %v32_v17 = vld [vmem:[%s398_s1 + $0x50] sm:$0xff] }
   0x5   :  { %234 = vmatpush3.bf16.msra.mxu0 %v231_v3  ;;  %271 = vmatpush3.bf16.msra.mxu1 %v231_v3  ;;  %v30_v14 = vld [vmem:[%s398_s1 + $0x40] sm:$0xff]  ;;  %v33_v18 = vld [vmem:[%s398_s1 + $0x58] sm:$0xff]  ;;  %v35_v21 = vld [vmem:[%s398_s1 + $0x68] sm:$0xff] }
   0x6   :  { %236 = vmatprep.subr.bf16.mxu0 %v235_v5  ;;  %264 = vmatprep.subr.bf16.mxu1 %v235_v5  ;;  %v247_v16 = vpack.c.bf16 %v31_v15, %v30_v14  ;;  %v251_v19 = vpack.c.bf16 %v33_v18, %v32_v17  ;;  %v34_v20 = vld [vmem:[%s398_s1 + $0x60] sm:$0xff]  ;;  %v36_v23 = vld [vmem:[%s398_s1 + $0x70] sm:$0xff]  ;;  %v37_v24 = vld [vmem:[%s398_s1 + $0x78] sm:$0xff] }
   0x7   :  { %219 = vmatprep.mubr.f32.mxu0 %v14_v9  ;;  %225 = vmatprep.mubr.f32.mxu1 %v18_v10  ;;  %v255_v22 = vpack.c.bf16 %v35_v21, %v34_v20  ;;  %v259_v25 = vpack.c.bf16 %v37_v24, %v36_v23  ;;  %v15_v26 = vld [vmem:[%s399_s0 + $0x8] sm:$0xff]  ;;  %v16_v28 = vld [vmem:[%s399_s0 + $0x10] sm:$0xff]  ;;  %v17_v30 = vld [vmem:[%s399_s0 + $0x18] sm:$0xff] }
   0x8   :  { %v19_v27 = vld [vmem:[%s399_s0 + $0x28] sm:$0xff]  ;;  %v20_v29 = vld [vmem:[%s399_s0 + $0x30] sm:$0xff]  ;;  %v21_v31 = vld [vmem:[%s399_s0 + $0x38] sm:$0xff] }
   0x9   :  { %238 = vmatpush3.bf16.msra.mxu0 %v235_v5  ;;  %272 = vmatpush3.bf16.msra.mxu1 %v235_v5  ;;  %v162_v32 = vld [vmem:[%s400_s2] ss:$0 sm:$0xff] }
   0xa   :  { %240 = vmatprep.subr.bf16.mxu0 %v239_v8  ;;  %265 = vmatprep.subr.bf16.mxu1 %v239_v8 }
   0xd   :  { %242 = vmatpush3.bf16.msra.mxu0 %v239_v8  ;;  %273 = vmatpush3.bf16.msra.mxu1 %v239_v8 }
   0xe   :  { %244 = vmatprep.subr.bf16.mxu0 %v243_v13  ;;  %266 = vmatprep.subr.bf16.mxu1 %v243_v13 }
  0x11   :  { %246 = vmatpush3.bf16.msra.mxu0 %v243_v13  ;;  %274 = vmatpush3.bf16.msra.mxu1 %v243_v13 }
  0x12   :  { %248 = vmatprep.subr.bf16.mxu0 %v247_v16  ;;  %267 = vmatprep.subr.bf16.mxu1 %v247_v16 }
  0x15   :  { %250 = vmatpush3.bf16.msra.mxu0 %v247_v16  ;;  %275 = vmatpush3.bf16.msra.mxu1 %v247_v16 }
  0x16   :  { %252 = vmatprep.subr.bf16.mxu0 %v251_v19  ;;  %268 = vmatprep.subr.bf16.mxu1 %v251_v19 }
  0x19   :  { %254 = vmatpush3.bf16.msra.mxu0 %v251_v19  ;;  %276 = vmatpush3.bf16.msra.mxu1 %v251_v19 }
  0x1a   :  { %256 = vmatprep.subr.bf16.mxu0 %v255_v22  ;;  %269 = vmatprep.subr.bf16.mxu1 %v255_v22 }
  0x1d   :  { %258 = vmatpush3.bf16.msra.mxu0 %v255_v22  ;;  %277 = vmatpush3.bf16.msra.mxu1 %v255_v22 }
  0x1e   :  { %260 = vmatprep.subr.bf16.mxu0 %v259_v25  ;;  %270 = vmatprep.subr.bf16.mxu1 %v259_v25 }
  0x21   :  { %262 = vmatpush3.bf16.msra.mxu0 %v259_v25  ;;  %278 = vmatpush3.bf16.msra.mxu1 %v259_v25 }
  0x24   :  { %220 = vmatmul.mubr.f32.vlgmr.msra.gmra.mrb[0].mxu0 %v15_v26  ;;  %226 = vmatmul.mubr.f32.vlgmr.msra.gmra.mrb[0].mxu1 %v19_v27 }
  0x25   :  { %222 = vmatprep.mubr.f32.mxu0 %v16_v28  ;;  %228 = vmatprep.mubr.f32.mxu1 %v20_v29 }
  0x28   :  { %223 = vmatmul.mubr.f32.gmra.mrb[2].mxu0 %v17_v30  ;;  %229 = vmatmul.mubr.f32.gmra.mrb[2].mxu1 %v21_v31 }
  0xf7   :  { %v221_v33 = vpop.f32.mrb[0].mxu0  ;;  %v227_v34 = vpop.f32.mrb[0].mxu1 }
  0xf8   :  { %v117_v35 = vadd.f32 %v221_v33, %v162_v32  ;;  %v137_v36 = vadd.f32 %v227_v34, %v162_v32  ;;  %v111_v37 = vpop.f32.mrb[1].mxu0  ;;  %v131_v38 = vpop.f32.mrb[1].mxu1 }
  0xf9   :  { %v112_v39 = vadd.f32 %v162_v32, %v111_v37  ;;  %v132_v40 = vadd.f32 %v162_v32, %v131_v38 }
  0xfa   :  { %151 = vst [vmem:[%s401_s3 + $0x8] sm:$0xff] %v117_v35  ;;  %155 = vst [vmem:[%s401_s3 + $0x28] sm:$0xff] %v137_v36 }
  0xfb   :  { %150 = vst [vmem:[%s401_s3] sm:$0xff] %v112_v39  ;;  %154 = vst [vmem:[%s401_s3 + $0x20] sm:$0xff] %v132_v40  ;;  %v224_v41 = vpop.f32.mrb[2].mxu0  ;;  %v230_v42 = vpop.f32.mrb[2].mxu1 }
  0xfc   :  { %v127_v43 = vadd.f32 %v224_v41, %v162_v32  ;;  %v147_v44 = vadd.f32 %v230_v42, %v162_v32  ;;  %v121_v45 = vpop.f32.mrb[3].mxu0  ;;  %v141_v46 = vpop.f32.mrb[3].mxu1 }
  0xfd   :  { %v122_v47 = vadd.f32 %v162_v32, %v121_v45  ;;  %v142_v48 = vadd.f32 %v162_v32, %v141_v46 }
  0xfe   :  { %153 = vst [vmem:[%s401_s3 + $0x18] sm:$0xff] %v127_v43  ;;  %157 = vst [vmem:[%s401_s3 + $0x38] sm:$0xff] %v147_v44 }
  0xff   :  { %152 = vst [vmem:[%s401_s3 + $0x10] sm:$0xff] %v122_v47  ;;  %156 = vst [vmem:[%s401_s3 + $0x30] sm:$0xff] %v142_v48 }

</bundles_post_ra>
